<compile_context>
chip_gen: v7x
topology: tpu7x:2x2x1
jax: 0.10.0
libtpu: 0.0.40
codegen_flags: <defaults>
</compile_context>

<pallas_src>
import functools

import jax
import jax.numpy as jnp
from jax.experimental import pallas as pl
from jax.experimental.pallas import tpu as pltpu


# ----------------------------------------------------------------------------
# Pallas kernel: the whole stacked-GRU recurrence in one invocation.
# ----------------------------------------------------------------------------
def make_gru_kernel(num_layers, seq_len, hidden_dim):
    H = hidden_dim

    def kernel(len_ref, u_ref, *args):
        # args = [per-layer: wih(in_l,3H) bf16, whh(H,3H) bf16,
        #                    bi(1,3H) f32 (r/z biases pre-folded), bhn(1,H) f32]
        #        + out_ref (B, H) f32
        gru_refs = args[: 4 * num_layers]
        out_ref = args[4 * num_layers]

        B = out_ref.shape[0]
        len_col = len_ref[...]                       # (B, 1) int32, loaded once

        # Hoist all weight/bias loads out of the time loop.
        layer_w = []
        for l in range(num_layers):
            layer_w.append((gru_refs[4 * l][...],        # (in_l, 3H) bf16
                            gru_refs[4 * l + 1][...],    # (H,    3H) bf16
                            gru_refs[4 * l + 2][...],    # (1,    3H) f32
                            gru_refs[4 * l + 3][...]))   # (1,     H) f32

        def step(t, hs):
            inp = u_ref[t]                                        # (B, G) bf16
            # packed-sequence mask: only rows with length > t update.
            mask = jnp.broadcast_to(len_col > t, (B, H))          # hoisted once/step
            new_hs = []
            for l in range(num_layers):
                wih, whh, bi, bhn = layer_w[l]
                h_prev = hs[l]                                    # (B, H) f32

                # Two fused MXU matmuls per layer per step (gates r|z|n packed).
                gi = jnp.dot(inp, wih,
                             preferred_element_type=jnp.float32) + bi      # (B,3H)
                gh = jnp.dot(h_prev.astype(jnp.bfloat16), whh,
                             preferred_element_type=jnp.float32)           # (B,3H)

                r = jax.nn.sigmoid(gi[:, 0 * H:1 * H] + gh[:, 0 * H:1 * H])
                z = jax.nn.sigmoid(gi[:, 1 * H:2 * H] + gh[:, 1 * H:2 * H])
                n = jnp.tanh(gi[:, 2 * H:3 * H] + r * (gh[:, 2 * H:3 * H] + bhn))
                h_new = (1.0 - z) * n + z * h_prev

                h_upd = jnp.where(mask, h_new, h_prev)
                new_hs.append(h_upd)
                inp = h_upd.astype(jnp.bfloat16)
            return tuple(new_hs)

        hs0 = tuple(jnp.zeros((B, H), jnp.float32) for _ in range(num_layers))
        hs = jax.lax.fori_loop(0, seq_len, step, hs0, unroll=True)

        out_ref[...] = hs[num_layers - 1]                          # lane-dense (B,H)

    return kernel


# ----------------------------------------------------------------------------
# Wrapper
# ----------------------------------------------------------------------------
def rnn_pallas(seqs, lengths, params, *, hidden_dim, num_layers):
    B, T, _ = seqs.shape
    H = hidden_dim

    # fc0 + tanh for ALL timesteps in one batched matmul (off the recurrent
    # critical path), then time-major + bf16 for the MXU.
    u = jnp.tanh(seqs.astype(jnp.float32) @ params["w0t"] + params["b0"])  # (B,T,G)
    u_tm = jnp.transpose(u, (1, 0, 2)).astype(jnp.bfloat16)                # (T,B,G)

    lengths2d = lengths.astype(jnp.int32).reshape(B, 1)

    inputs = [lengths2d, u_tm]
    for l in range(num_layers):
        wih, whh, bih, bhh = params["gru"][l]
        # Fuse the 3 gate matmuls per source: (3,in,H)->(in,3H), (3,H,H)->(H,3H).
        wih_f = jnp.concatenate([wih[0], wih[1], wih[2]], axis=1).astype(jnp.bfloat16)
        whh_f = jnp.concatenate([whh[0], whh[1], whh[2]], axis=1).astype(jnp.bfloat16)
        # Pre-fold r/z input+hidden biases; keep b_hn separate (inside r*gh_n).
        bi_f = jnp.concatenate([bih[0] + bhh[0], bih[1] + bhh[1], bih[2]], axis=1)
        bhn = bhh[2]
        inputs += [wih_f, whh_f, bi_f.astype(jnp.float32), bhn.astype(jnp.float32)]

    vmem = pl.BlockSpec(memory_space=pltpu.MemorySpace.VMEM)
    kernel = make_gru_kernel(num_layers, T, H)
    h_n = pl.pallas_call(
        kernel,
        out_shape=jax.ShapeDtypeStruct((B, H), jnp.float32),
        in_specs=[vmem] * len(inputs),
        out_specs=vmem,
    )(*inputs)

    # fc1 in the wrapper keeps the kernel output lane-dense.
    return h_n @ params["w1t"] + params["b1"]


# ----------------------------------------------------------------------------
# Pure-JAX f32 reference (same math, original per-gate parameter layout)
# ----------------------------------------------------------------------------
def rnn_reference(seqs, lengths, params, *, hidden_dim, num_layers):
    B, T, _ = seqs.shape
    u = jnp.tanh(seqs.astype(jnp.float32) @ params["w0t"] + params["b0"])
    h = jnp.zeros((num_layers, B, hidden_dim), jnp.float32)
    for t in range(T):
        mask = (lengths > t)[:, None]
        inp = u[:, t, :]
        new_h = []
        for l in range(num_layers):
            wih, whh, bih, bhh = params["gru"][l]
            h_prev = h[l]
            gi_r = inp @ wih[0] + bih[0]
            gi_z = inp @ wih[1] + bih[1]
            gi_n = inp @ wih[2] + bih[2]
            gh_r = h_prev @ whh[0] + bhh[0]
            gh_z = h_prev @ whh[1] + bhh[1]
            gh_n = h_prev @ whh[2] + bhh[2]
            r = jax.nn.sigmoid(gi_r + gh_r)
            z = jax.nn.sigmoid(gi_z + gh_z)
            n = jnp.tanh(gi_n + r * gh_n)
            h_new = (1.0 - z) * n + z * h_prev
            h_upd = jnp.where(mask, h_new, h_prev)
            new_h.append(h_upd)
            inp = h_upd
        h = jnp.stack(new_h)
    return h[-1] @ params["w1t"] + params["b1"]


# ----------------------------------------------------------------------------
# Deterministic parameter init (shapes follow the PyTorch module __init__)
# ----------------------------------------------------------------------------
def init_params(key, dim_input, gru_input, hidden_dim, num_layers):
    def unif(k, shape, fan_in):
        bound = 1.0 / jnp.sqrt(jnp.float32(fan_in))
        return jax.random.uniform(k, shape, jnp.float32, -bound, bound)

    keys = iter(jax.random.split(key, 8 + 4 * num_layers))
    params = {
        # fc0: Linear(dim_input, gru_input); stored transposed (in, out)
        "w0t": unif(next(keys), (dim_input, gru_input), dim_input),
        "b0":  unif(next(keys), (1, gru_input), dim_input),
        # fc1: Linear(hidden_dim, 2); stored transposed (in, out)
        "w1t": unif(next(keys), (hidden_dim, 2), hidden_dim),
        "b1":  unif(next(keys), (1, 2), hidden_dim),
        "gru": [],
    }
    for l in range(num_layers):
        in_l = gru_input if l == 0 else hidden_dim
        wih = unif(next(keys), (3, in_l, hidden_dim), hidden_dim)   # gates r,z,n
        whh = unif(next(keys), (3, hidden_dim, hidden_dim), hidden_dim)
        bih = unif(next(keys), (3, 1, hidden_dim), hidden_dim)
        bhh = unif(next(keys), (3, 1, hidden_dim), hidden_dim)
        params["gru"].append((wih, whh, bih, bhh))
    return params


# ----------------------------------------------------------------------------
if __name__ == "__main__":
    # Module hyper-params (dropout=0.0 -> matches eval semantics exactly).
    DIM_INPUT, GRU_INPUT, HIDDEN_DIM, LAYER_SIZE = 16, 32, 32, 2
    B, T = 4, 8

    key = jax.random.PRNGKey(0)
    k_param, k_seq = jax.random.split(key)

    params = init_params(k_param, DIM_INPUT, GRU_INPUT, HIDDEN_DIM, LAYER_SIZE)

    seqs = jax.random.normal(k_seq, (B, T, DIM_INPUT), jnp.float32)
    # pack_padded_sequence default enforce_sorted=True -> descending lengths.
    lengths = jnp.array([8, 6, 5, 3], dtype=jnp.int32)

    fwd = jax.jit(functools.partial(rnn_pallas,
                                    hidden_dim=HIDDEN_DIM, num_layers=LAYER_SIZE))
    out = jax.block_until_ready(fwd(seqs, lengths, params))

    ref = rnn_reference(seqs, lengths, params,
                        hidden_dim=HIDDEN_DIM, num_layers=LAYER_SIZE)
    assert out.shape == (B, 2)
    # Tolerance covers bf16 MXU operands vs the all-f32 reference.
    assert jnp.allclose(out, ref, atol=2e-2, rtol=2e-2)

    print("KERNEL_OK")
</pallas_src>

<mosaic_0001>
module attributes {stable_mosaic.version = 11 : i64} {
  func.func @kernel(%arg0: memref<4x1xi32, #tpu.memory_space<vmem>>, %arg1: memref<8x4x32xbf16, #tpu.memory_space<vmem>>, %arg2: memref<32x96xbf16, #tpu.memory_space<vmem>>, %arg3: memref<32x96xbf16, #tpu.memory_space<vmem>>, %arg4: memref<1x96xf32, #tpu.memory_space<vmem>>, %arg5: memref<1x32xf32, #tpu.memory_space<vmem>>, %arg6: memref<32x96xbf16, #tpu.memory_space<vmem>>, %arg7: memref<32x96xbf16, #tpu.memory_space<vmem>>, %arg8: memref<1x96xf32, #tpu.memory_space<vmem>>, %arg9: memref<1x32xf32, #tpu.memory_space<vmem>>, %arg10: memref<4x32xf32, #tpu.memory_space<vmem>>) attributes {dimension_semantics = [], scalar_prefetch = 0 : i64, scratch_operands = 0 : i64, tpu.core_type = #tpu.core_type<tc>} {
    %c0 = arith.constant 0 : index
    %c0_0 = arith.constant 0 : index
    %0 = vector.load %arg0[%c0, %c0_0] : memref<4x1xi32, #tpu.memory_space<vmem>>, vector<4x1xi32>
    %c0_1 = arith.constant 0 : index
    %c0_2 = arith.constant 0 : index
    %1 = vector.load %arg2[%c0_1, %c0_2] : memref<32x96xbf16, #tpu.memory_space<vmem>>, vector<32x96xbf16>
    %c0_3 = arith.constant 0 : index
    %c0_4 = arith.constant 0 : index
    %2 = vector.load %arg3[%c0_3, %c0_4] : memref<32x96xbf16, #tpu.memory_space<vmem>>, vector<32x96xbf16>
    %c0_5 = arith.constant 0 : index
    %c0_6 = arith.constant 0 : index
    %3 = vector.load %arg4[%c0_5, %c0_6] : memref<1x96xf32, #tpu.memory_space<vmem>>, vector<1x96xf32>
    %c0_7 = arith.constant 0 : index
    %c0_8 = arith.constant 0 : index
    %4 = vector.load %arg5[%c0_7, %c0_8] : memref<1x32xf32, #tpu.memory_space<vmem>>, vector<1x32xf32>
    %c0_9 = arith.constant 0 : index
    %c0_10 = arith.constant 0 : index
    %5 = vector.load %arg6[%c0_9, %c0_10] : memref<32x96xbf16, #tpu.memory_space<vmem>>, vector<32x96xbf16>
    %c0_11 = arith.constant 0 : index
    %c0_12 = arith.constant 0 : index
    %6 = vector.load %arg7[%c0_11, %c0_12] : memref<32x96xbf16, #tpu.memory_space<vmem>>, vector<32x96xbf16>
    %c0_13 = arith.constant 0 : index
    %c0_14 = arith.constant 0 : index
    %7 = vector.load %arg8[%c0_13, %c0_14] : memref<1x96xf32, #tpu.memory_space<vmem>>, vector<1x96xf32>
    %c0_15 = arith.constant 0 : index
    %c0_16 = arith.constant 0 : index
    %8 = vector.load %arg9[%c0_15, %c0_16] : memref<1x32xf32, #tpu.memory_space<vmem>>, vector<1x32xf32>
    %cst = arith.constant 0.000000e+00 : f32
    %9 = vector.broadcast %cst : f32 to vector<4x32xf32>
    %cst_17 = arith.constant 0.000000e+00 : f32
    %10 = vector.broadcast %cst_17 : f32 to vector<4x32xf32>
    %c0_i32 = arith.constant 0 : i32
    %11 = arith.index_cast %c0_i32 : i32 to index
    %c0_18 = arith.constant 0 : index
    %c0_19 = arith.constant 0 : index
    %12 = vector.load %arg1[%11, %c0_18, %c0_19] : memref<8x4x32xbf16, #tpu.memory_space<vmem>>, vector<1x4x32xbf16>
    %13 = vector.shape_cast %12 : vector<1x4x32xbf16> to vector<4x32xbf16>
    %14 = vector.broadcast %c0_i32 : i32 to vector<4x1xi32>
    %15 = arith.cmpi sgt, %0, %14 : vector<4x1xi32>
    %16 = vector.shape_cast %15 : vector<4x1xi1> to vector<4x1xi1>
    %17 = vector.broadcast %16 : vector<4x1xi1> to vector<4x32xi1>
    %cst_20 = arith.constant dense<0.000000e+00> : vector<4x96xf32>
    %18 = tpu.matmul %13, %1, %cst_20 {dimension_numbers = #tpu.dot_dimension_numbers<[1], [0], [0], [1], [0, 0, 1, 1], [], []>} : vector<4x32xbf16>, vector<32x96xbf16>, vector<4x96xf32> -> vector<4x96xf32>
    %19 = vector.broadcast %3 : vector<1x96xf32> to vector<4x96xf32>
    %20 = arith.addf %18, %19 : vector<4x96xf32>
    %21 = arith.truncf %9 : vector<4x32xf32> to vector<4x32xbf16>
    %cst_21 = arith.constant dense<0.000000e+00> : vector<4x96xf32>
    %22 = tpu.matmul %21, %2, %cst_21 {dimension_numbers = #tpu.dot_dimension_numbers<[1], [0], [0], [1], [0, 0, 1, 1], [], []>} : vector<4x32xbf16>, vector<32x96xbf16>, vector<4x96xf32> -> vector<4x96xf32>
    %23 = vector.extract_strided_slice %20 {offsets = [0, 0], sizes = [4, 32], strides = [1, 1]} : vector<4x96xf32> to vector<4x32xf32>
    %24 = vector.extract_strided_slice %22 {offsets = [0, 0], sizes = [4, 32], strides = [1, 1]} : vector<4x96xf32> to vector<4x32xf32>
    %25 = arith.addf %23, %24 : vector<4x32xf32>
    %26 = arith.negf %25 : vector<4x32xf32>
    %27 = math.exp %26 : vector<4x32xf32>
    %cst_22 = arith.constant 1.000000e+00 : f32
    %28 = vector.broadcast %cst_22 : f32 to vector<4x32xf32>
    %29 = arith.addf %28, %27 : vector<4x32xf32>
    %30 = arith.divf %28, %29 : vector<4x32xf32>
    %31 = vector.extract_strided_slice %20 {offsets = [0, 32], sizes = [4, 32], strides = [1, 1]} : vector<4x96xf32> to vector<4x32xf32>
    %32 = vector.extract_strided_slice %22 {offsets = [0, 32], sizes = [4, 32], strides = [1, 1]} : vector<4x96xf32> to vector<4x32xf32>
    %33 = arith.addf %31, %32 : vector<4x32xf32>
    %34 = arith.negf %33 : vector<4x32xf32>
    %35 = math.exp %34 : vector<4x32xf32>
    %cst_23 = arith.constant 1.000000e+00 : f32
    %36 = vector.broadcast %cst_23 : f32 to vector<4x32xf32>
    %37 = arith.addf %36, %35 : vector<4x32xf32>
    %38 = arith.divf %36, %37 : vector<4x32xf32>
    %39 = vector.extract_strided_slice %20 {offsets = [0, 64], sizes = [4, 32], strides = [1, 1]} : vector<4x96xf32> to vector<4x32xf32>
    %40 = vector.extract_strided_slice %22 {offsets = [0, 64], sizes = [4, 32], strides = [1, 1]} : vector<4x96xf32> to vector<4x32xf32>
    %41 = vector.broadcast %4 : vector<1x32xf32> to vector<4x32xf32>
    %42 = arith.addf %40, %41 : vector<4x32xf32>
    %43 = arith.mulf %30, %42 : vector<4x32xf32>
    %44 = arith.addf %39, %43 : vector<4x32xf32>
    %45 = math.tanh %44 : vector<4x32xf32>
    %cst_24 = arith.constant 1.000000e+00 : f32
    %46 = vector.broadcast %cst_24 : f32 to vector<4x32xf32>
    %47 = arith.subf %46, %38 : vector<4x32xf32>
    %48 = arith.mulf %47, %45 : vector<4x32xf32>
    %49 = arith.mulf %38, %9 : vector<4x32xf32>
    %50 = arith.addf %48, %49 : vector<4x32xf32>
    %51 = arith.select %17, %50, %9 : vector<4x32xi1>, vector<4x32xf32>
    %52 = arith.truncf %51 : vector<4x32xf32> to vector<4x32xbf16>
    %cst_25 = arith.constant dense<0.000000e+00> : vector<4x96xf32>
    %53 = tpu.matmul %52, %5, %cst_25 {dimension_numbers = #tpu.dot_dimension_numbers<[1], [0], [0], [1], [0, 0, 1, 1], [], []>} : vector<4x32xbf16>, vector<32x96xbf16>, vector<4x96xf32> -> vector<4x96xf32>
    %54 = vector.broadcast %7 : vector<1x96xf32> to vector<4x96xf32>
    %55 = arith.addf %53, %54 : vector<4x96xf32>
    %56 = arith.truncf %10 : vector<4x32xf32> to vector<4x32xbf16>
    %cst_26 = arith.constant dense<0.000000e+00> : vector<4x96xf32>
    %57 = tpu.matmul %56, %6, %cst_26 {dimension_numbers = #tpu.dot_dimension_numbers<[1], [0], [0], [1], [0, 0, 1, 1], [], []>} : vector<4x32xbf16>, vector<32x96xbf16>, vector<4x96xf32> -> vector<4x96xf32>
    %58 = vector.extract_strided_slice %55 {offsets = [0, 0], sizes = [4, 32], strides = [1, 1]} : vector<4x96xf32> to vector<4x32xf32>
    %59 = vector.extract_strided_slice %57 {offsets = [0, 0], sizes = [4, 32], strides = [1, 1]} : vector<4x96xf32> to vector<4x32xf32>
    %60 = arith.addf %58, %59 : vector<4x32xf32>
    %61 = arith.negf %60 : vector<4x32xf32>
    %62 = math.exp %61 : vector<4x32xf32>
    %cst_27 = arith.constant 1.000000e+00 : f32
    %63 = vector.broadcast %cst_27 : f32 to vector<4x32xf32>
    %64 = arith.addf %63, %62 : vector<4x32xf32>
    %65 = arith.divf %63, %64 : vector<4x32xf32>
    %66 = vector.extract_strided_slice %55 {offsets = [0, 32], sizes = [4, 32], strides = [1, 1]} : vector<4x96xf32> to vector<4x32xf32>
    %67 = vector.extract_strided_slice %57 {offsets = [0, 32], sizes = [4, 32], strides = [1, 1]} : vector<4x96xf32> to vector<4x32xf32>
    %68 = arith.addf %66, %67 : vector<4x32xf32>
    %69 = arith.negf %68 : vector<4x32xf32>
    %70 = math.exp %69 : vector<4x32xf32>
    %cst_28 = arith.constant 1.000000e+00 : f32
    %71 = vector.broadcast %cst_28 : f32 to vector<4x32xf32>
    %72 = arith.addf %71, %70 : vector<4x32xf32>
    %73 = arith.divf %71, %72 : vector<4x32xf32>
    %74 = vector.extract_strided_slice %55 {offsets = [0, 64], sizes = [4, 32], strides = [1, 1]} : vector<4x96xf32> to vector<4x32xf32>
    %75 = vector.extract_strided_slice %57 {offsets = [0, 64], sizes = [4, 32], strides = [1, 1]} : vector<4x96xf32> to vector<4x32xf32>
    %76 = vector.broadcast %8 : vector<1x32xf32> to vector<4x32xf32>
    %77 = arith.addf %75, %76 : vector<4x32xf32>
    %78 = arith.mulf %65, %77 : vector<4x32xf32>
    %79 = arith.addf %74, %78 : vector<4x32xf32>
    %80 = math.tanh %79 : vector<4x32xf32>
    %cst_29 = arith.constant 1.000000e+00 : f32
    %81 = vector.broadcast %cst_29 : f32 to vector<4x32xf32>
    %82 = arith.subf %81, %73 : vector<4x32xf32>
    %83 = arith.mulf %82, %80 : vector<4x32xf32>
    %84 = arith.mulf %73, %10 : vector<4x32xf32>
    %85 = arith.addf %83, %84 : vector<4x32xf32>
    %86 = arith.select %17, %85, %10 : vector<4x32xi1>, vector<4x32xf32>
    %c1_i32 = arith.constant 1 : i32
    %87 = arith.index_cast %c1_i32 : i32 to index
    %c0_30 = arith.constant 0 : index
    %c0_31 = arith.constant 0 : index
    %88 = vector.load %arg1[%87, %c0_30, %c0_31] : memref<8x4x32xbf16, #tpu.memory_space<vmem>>, vector<1x4x32xbf16>
    %89 = vector.shape_cast %88 : vector<1x4x32xbf16> to vector<4x32xbf16>
    %90 = vector.broadcast %c1_i32 : i32 to vector<4x1xi32>
    %91 = arith.cmpi sgt, %0, %90 : vector<4x1xi32>
    %92 = vector.shape_cast %91 : vector<4x1xi1> to vector<4x1xi1>
    %93 = vector.broadcast %92 : vector<4x1xi1> to vector<4x32xi1>
    %cst_32 = arith.constant dense<0.000000e+00> : vector<4x96xf32>
    %94 = tpu.matmul %89, %1, %cst_32 {dimension_numbers = #tpu.dot_dimension_numbers<[1], [0], [0], [1], [0, 0, 1, 1], [], []>} : vector<4x32xbf16>, vector<32x96xbf16>, vector<4x96xf32> -> vector<4x96xf32>
    %95 = vector.broadcast %3 : vector<1x96xf32> to vector<4x96xf32>
    %96 = arith.addf %94, %95 : vector<4x96xf32>
    %97 = arith.truncf %51 : vector<4x32xf32> to vector<4x32xbf16>
    %cst_33 = arith.constant dense<0.000000e+00> : vector<4x96xf32>
    %98 = tpu.matmul %97, %2, %cst_33 {dimension_numbers = #tpu.dot_dimension_numbers<[1], [0], [0], [1], [0, 0, 1, 1], [], []>} : vector<4x32xbf16>, vector<32x96xbf16>, vector<4x96xf32> -> vector<4x96xf32>
    %99 = vector.extract_strided_slice %96 {offsets = [0, 0], sizes = [4, 32], strides = [1, 1]} : vector<4x96xf32> to vector<4x32xf32>
    %100 = vector.extract_strided_slice %98 {offsets = [0, 0], sizes = [4, 32], strides = [1, 1]} : vector<4x96xf32> to vector<4x32xf32>
    %101 = arith.addf %99, %100 : vector<4x32xf32>
    %102 = arith.negf %101 : vector<4x32xf32>
    %103 = math.exp %102 : vector<4x32xf32>
    %cst_34 = arith.constant 1.000000e+00 : f32
    %104 = vector.broadcast %cst_34 : f32 to vector<4x32xf32>
    %105 = arith.addf %104, %103 : vector<4x32xf32>
    %106 = arith.divf %104, %105 : vector<4x32xf32>
    %107 = vector.extract_strided_slice %96 {offsets = [0, 32], sizes = [4, 32], strides = [1, 1]} : vector<4x96xf32> to vector<4x32xf32>
    %108 = vector.extract_strided_slice %98 {offsets = [0, 32], sizes = [4, 32], strides = [1, 1]} : vector<4x96xf32> to vector<4x32xf32>
    %109 = arith.addf %107, %108 : vector<4x32xf32>
    %110 = arith.negf %109 : vector<4x32xf32>
    %111 = math.exp %110 : vector<4x32xf32>
    %cst_35 = arith.constant 1.000000e+00 : f32
    %112 = vector.broadcast %cst_35 : f32 to vector<4x32xf32>
    %113 = arith.addf %112, %111 : vector<4x32xf32>
    %114 = arith.divf %112, %113 : vector<4x32xf32>
    %115 = vector.extract_strided_slice %96 {offsets = [0, 64], sizes = [4, 32], strides = [1, 1]} : vector<4x96xf32> to vector<4x32xf32>
    %116 = vector.extract_strided_slice %98 {offsets = [0, 64], sizes = [4, 32], strides = [1, 1]} : vector<4x96xf32> to vector<4x32xf32>
    %117 = vector.broadcast %4 : vector<1x32xf32> to vector<4x32xf32>
    %118 = arith.addf %116, %117 : vector<4x32xf32>
    %119 = arith.mulf %106, %118 : vector<4x32xf32>
    %120 = arith.addf %115, %119 : vector<4x32xf32>
    %121 = math.tanh %120 : vector<4x32xf32>
    %cst_36 = arith.constant 1.000000e+00 : f32
    %122 = vector.broadcast %cst_36 : f32 to vector<4x32xf32>
    %123 = arith.subf %122, %114 : vector<4x32xf32>
    %124 = arith.mulf %123, %121 : vector<4x32xf32>
    %125 = arith.mulf %114, %51 : vector<4x32xf32>
    %126 = arith.addf %124, %125 : vector<4x32xf32>
    %127 = arith.select %93, %126, %51 : vector<4x32xi1>, vector<4x32xf32>
    %128 = arith.truncf %127 : vector<4x32xf32> to vector<4x32xbf16>
    %cst_37 = arith.constant dense<0.000000e+00> : vector<4x96xf32>
    %129 = tpu.matmul %128, %5, %cst_37 {dimension_numbers = #tpu.dot_dimension_numbers<[1], [0], [0], [1], [0, 0, 1, 1], [], []>} : vector<4x32xbf16>, vector<32x96xbf16>, vector<4x96xf32> -> vector<4x96xf32>
    %130 = vector.broadcast %7 : vector<1x96xf32> to vector<4x96xf32>
    %131 = arith.addf %129, %130 : vector<4x96xf32>
    %132 = arith.truncf %86 : vector<4x32xf32> to vector<4x32xbf16>
    %cst_38 = arith.constant dense<0.000000e+00> : vector<4x96xf32>
    %133 = tpu.matmul %132, %6, %cst_38 {dimension_numbers = #tpu.dot_dimension_numbers<[1], [0], [0], [1], [0, 0, 1, 1], [], []>} : vector<4x32xbf16>, vector<32x96xbf16>, vector<4x96xf32> -> vector<4x96xf32>
    %134 = vector.extract_strided_slice %131 {offsets = [0, 0], sizes = [4, 32], strides = [1, 1]} : vector<4x96xf32> to vector<4x32xf32>
    %135 = vector.extract_strided_slice %133 {offsets = [0, 0], sizes = [4, 32], strides = [1, 1]} : vector<4x96xf32> to vector<4x32xf32>
    %136 = arith.addf %134, %135 : vector<4x32xf32>
    %137 = arith.negf %136 : vector<4x32xf32>
    %138 = math.exp %137 : vector<4x32xf32>
    %cst_39 = arith.constant 1.000000e+00 : f32
    %139 = vector.broadcast %cst_39 : f32 to vector<4x32xf32>
    %140 = arith.addf %139, %138 : vector<4x32xf32>
    %141 = arith.divf %139, %140 : vector<4x32xf32>
    %142 = vector.extract_strided_slice %131 {offsets = [0, 32], sizes = [4, 32], strides = [1, 1]} : vector<4x96xf32> to vector<4x32xf32>
    %143 = vector.extract_strided_slice %133 {offsets = [0, 32], sizes = [4, 32], strides = [1, 1]} : vector<4x96xf32> to vector<4x32xf32>
    %144 = arith.addf %142, %143 : vector<4x32xf32>
    %145 = arith.negf %144 : vector<4x32xf32>
    %146 = math.exp %145 : vector<4x32xf32>
    %cst_40 = arith.constant 1.000000e+00 : f32
    %147 = vector.broadcast %cst_40 : f32 to vector<4x32xf32>
    %148 = arith.addf %147, %146 : vector<4x32xf32>
    %149 = arith.divf %147, %148 : vector<4x32xf32>
    %150 = vector.extract_strided_slice %131 {offsets = [0, 64], sizes = [4, 32], strides = [1, 1]} : vector<4x96xf32> to vector<4x32xf32>
    %151 = vector.extract_strided_slice %133 {offsets = [0, 64], sizes = [4, 32], strides = [1, 1]} : vector<4x96xf32> to vector<4x32xf32>
    %152 = vector.broadcast %8 : vector<1x32xf32> to vector<4x32xf32>
    %153 = arith.addf %151, %152 : vector<4x32xf32>
    %154 = arith.mulf %141, %153 : vector<4x32xf32>
    %155 = arith.addf %150, %154 : vector<4x32xf32>
    %156 = math.tanh %155 : vector<4x32xf32>
    %cst_41 = arith.constant 1.000000e+00 : f32
    %157 = vector.broadcast %cst_41 : f32 to vector<4x32xf32>
    %158 = arith.subf %157, %149 : vector<4x32xf32>
    %159 = arith.mulf %158, %156 : vector<4x32xf32>
    %160 = arith.mulf %149, %86 : vector<4x32xf32>
    %161 = arith.addf %159, %160 : vector<4x32xf32>
    %162 = arith.select %93, %161, %86 : vector<4x32xi1>, vector<4x32xf32>
    %c2_i32 = arith.constant 2 : i32
    %163 = arith.index_cast %c2_i32 : i32 to index
    %c0_42 = arith.constant 0 : index
    %c0_43 = arith.constant 0 : index
    %164 = vector.load %arg1[%163, %c0_42, %c0_43] : memref<8x4x32xbf16, #tpu.memory_space<vmem>>, vector<1x4x32xbf16>
    %165 = vector.shape_cast %164 : vector<1x4x32xbf16> to vector<4x32xbf16>
    %166 = vector.broadcast %c2_i32 : i32 to vector<4x1xi32>
    %167 = arith.cmpi sgt, %0, %166 : vector<4x1xi32>
    %168 = vector.shape_cast %167 : vector<4x1xi1> to vector<4x1xi1>
    %169 = vector.broadcast %168 : vector<4x1xi1> to vector<4x32xi1>
    %cst_44 = arith.constant dense<0.000000e+00> : vector<4x96xf32>
    %170 = tpu.matmul %165, %1, %cst_44 {dimension_numbers = #tpu.dot_dimension_numbers<[1], [0], [0], [1], [0, 0, 1, 1], [], []>} : vector<4x32xbf16>, vector<32x96xbf16>, vector<4x96xf32> -> vector<4x96xf32>
    %171 = vector.broadcast %3 : vector<1x96xf32> to vector<4x96xf32>
    %172 = arith.addf %170, %171 : vector<4x96xf32>
    %173 = arith.truncf %127 : vector<4x32xf32> to vector<4x32xbf16>
    %cst_45 = arith.constant dense<0.000000e+00> : vector<4x96xf32>
    %174 = tpu.matmul %173, %2, %cst_45 {dimension_numbers = #tpu.dot_dimension_numbers<[1], [0], [0], [1], [0, 0, 1, 1], [], []>} : vector<4x32xbf16>, vector<32x96xbf16>, vector<4x96xf32> -> vector<4x96xf32>
    %175 = vector.extract_strided_slice %172 {offsets = [0, 0], sizes = [4, 32], strides = [1, 1]} : vector<4x96xf32> to vector<4x32xf32>
    %176 = vector.extract_strided_slice %174 {offsets = [0, 0], sizes = [4, 32], strides = [1, 1]} : vector<4x96xf32> to vector<4x32xf32>
    %177 = arith.addf %175, %176 : vector<4x32xf32>
    %178 = arith.negf %177 : vector<4x32xf32>
    %179 = math.exp %178 : vector<4x32xf32>
    %cst_46 = arith.constant 1.000000e+00 : f32
    %180 = vector.broadcast %cst_46 : f32 to vector<4x32xf32>
    %181 = arith.addf %180, %179 : vector<4x32xf32>
    %182 = arith.divf %180, %181 : vector<4x32xf32>
    %183 = vector.extract_strided_slice %172 {offsets = [0, 32], sizes = [4, 32], strides = [1, 1]} : vector<4x96xf32> to vector<4x32xf32>
    %184 = vector.extract_strided_slice %174 {offsets = [0, 32], sizes = [4, 32], strides = [1, 1]} : vector<4x96xf32> to vector<4x32xf32>
    %185 = arith.addf %183, %184 : vector<4x32xf32>
    %186 = arith.negf %185 : vector<4x32xf32>
    %187 = math.exp %186 : vector<4x32xf32>
    %cst_47 = arith.constant 1.000000e+00 : f32
    %188 = vector.broadcast %cst_47 : f32 to vector<4x32xf32>
    %189 = arith.addf %188, %187 : vector<4x32xf32>
    %190 = arith.divf %188, %189 : vector<4x32xf32>
    %191 = vector.extract_strided_slice %172 {offsets = [0, 64], sizes = [4, 32], strides = [1, 1]} : vector<4x96xf32> to vector<4x32xf32>
    %192 = vector.extract_strided_slice %174 {offsets = [0, 64], sizes = [4, 32], strides = [1, 1]} : vector<4x96xf32> to vector<4x32xf32>
    %193 = vector.broadcast %4 : vector<1x32xf32> to vector<4x32xf32>
    %194 = arith.addf %192, %193 : vector<4x32xf32>
    %195 = arith.mulf %182, %194 : vector<4x32xf32>
    %196 = arith.addf %191, %195 : vector<4x32xf32>
    %197 = math.tanh %196 : vector<4x32xf32>
    %cst_48 = arith.constant 1.000000e+00 : f32
    %198 = vector.broadcast %cst_48 : f32 to vector<4x32xf32>
    %199 = arith.subf %198, %190 : vector<4x32xf32>
    %200 = arith.mulf %199, %197 : vector<4x32xf32>
    %201 = arith.mulf %190, %127 : vector<4x32xf32>
    %202 = arith.addf %200, %201 : vector<4x32xf32>
    %203 = arith.select %169, %202, %127 : vector<4x32xi1>, vector<4x32xf32>
    %204 = arith.truncf %203 : vector<4x32xf32> to vector<4x32xbf16>
    %cst_49 = arith.constant dense<0.000000e+00> : vector<4x96xf32>
    %205 = tpu.matmul %204, %5, %cst_49 {dimension_numbers = #tpu.dot_dimension_numbers<[1], [0], [0], [1], [0, 0, 1, 1], [], []>} : vector<4x32xbf16>, vector<32x96xbf16>, vector<4x96xf32> -> vector<4x96xf32>
    %206 = vector.broadcast %7 : vector<1x96xf32> to vector<4x96xf32>
    %207 = arith.addf %205, %206 : vector<4x96xf32>
    %208 = arith.truncf %162 : vector<4x32xf32> to vector<4x32xbf16>
    %cst_50 = arith.constant dense<0.000000e+00> : vector<4x96xf32>
    %209 = tpu.matmul %208, %6, %cst_50 {dimension_numbers = #tpu.dot_dimension_numbers<[1], [0], [0], [1], [0, 0, 1, 1], [], []>} : vector<4x32xbf16>, vector<32x96xbf16>, vector<4x96xf32> -> vector<4x96xf32>
    %210 = vector.extract_strided_slice %207 {offsets = [0, 0], sizes = [4, 32], strides = [1, 1]} : vector<4x96xf32> to vector<4x32xf32>
    %211 = vector.extract_strided_slice %209 {offsets = [0, 0], sizes = [4, 32], strides = [1, 1]} : vector<4x96xf32> to vector<4x32xf32>
    %212 = arith.addf %210, %211 : vector<4x32xf32>
    %213 = arith.negf %212 : vector<4x32xf32>
    %214 = math.exp %213 : vector<4x32xf32>
    %cst_51 = arith.constant 1.000000e+00 : f32
    %215 = vector.broadcast %cst_51 : f32 to vector<4x32xf32>
    %216 = arith.addf %215, %214 : vector<4x32xf32>
    %217 = arith.divf %215, %216 : vector<4x32xf32>
    %218 = vector.extract_strided_slice %207 {offsets = [0, 32], sizes = [4, 32], strides = [1, 1]} : vector<4x96xf32> to vector<4x32xf32>
    %219 = vector.extract_strided_slice %209 {offsets = [0, 32], sizes = [4, 32], strides = [1, 1]} : vector<4x96xf32> to vector<4x32xf32>
    %220 = arith.addf %218, %219 : vector<4x32xf32>
    %221 = arith.negf %220 : vector<4x32xf32>
    %222 = math.exp %221 : vector<4x32xf32>
    %cst_52 = arith.constant 1.000000e+00 : f32
    %223 = vector.broadcast %cst_52 : f32 to vector<4x32xf32>
    %224 = arith.addf %223, %222 : vector<4x32xf32>
    %225 = arith.divf %223, %224 : vector<4x32xf32>
    %226 = vector.extract_strided_slice %207 {offsets = [0, 64], sizes = [4, 32], strides = [1, 1]} : vector<4x96xf32> to vector<4x32xf32>
    %227 = vector.extract_strided_slice %209 {offsets = [0, 64], sizes = [4, 32], strides = [1, 1]} : vector<4x96xf32> to vector<4x32xf32>
    %228 = vector.broadcast %8 : vector<1x32xf32> to vector<4x32xf32>
    %229 = arith.addf %227, %228 : vector<4x32xf32>
    %230 = arith.mulf %217, %229 : vector<4x32xf32>
    %231 = arith.addf %226, %230 : vector<4x32xf32>
    %232 = math.tanh %231 : vector<4x32xf32>
    %cst_53 = arith.constant 1.000000e+00 : f32
    %233 = vector.broadcast %cst_53 : f32 to vector<4x32xf32>
    %234 = arith.subf %233, %225 : vector<4x32xf32>
    %235 = arith.mulf %234, %232 : vector<4x32xf32>
    %236 = arith.mulf %225, %162 : vector<4x32xf32>
    %237 = arith.addf %235, %236 : vector<4x32xf32>
    %238 = arith.select %169, %237, %162 : vector<4x32xi1>, vector<4x32xf32>
    %c3_i32 = arith.constant 3 : i32
    %239 = arith.index_cast %c3_i32 : i32 to index
    %c0_54 = arith.constant 0 : index
    %c0_55 = arith.constant 0 : index
    %240 = vector.load %arg1[%239, %c0_54, %c0_55] : memref<8x4x32xbf16, #tpu.memory_space<vmem>>, vector<1x4x32xbf16>
    %241 = vector.shape_cast %240 : vector<1x4x32xbf16> to vector<4x32xbf16>
    %242 = vector.broadcast %c3_i32 : i32 to vector<4x1xi32>
    %243 = arith.cmpi sgt, %0, %242 : vector<4x1xi32>
    %244 = vector.shape_cast %243 : vector<4x1xi1> to vector<4x1xi1>
    %245 = vector.broadcast %244 : vector<4x1xi1> to vector<4x32xi1>
    %cst_56 = arith.constant dense<0.000000e+00> : vector<4x96xf32>
    %246 = tpu.matmul %241, %1, %cst_56 {dimension_numbers = #tpu.dot_dimension_numbers<[1], [0], [0], [1], [0, 0, 1, 1], [], []>} : vector<4x32xbf16>, vector<32x96xbf16>, vector<4x96xf32> -> vector<4x96xf32>
    %247 = vector.broadcast %3 : vector<1x96xf32> to vector<4x96xf32>
    %248 = arith.addf %246, %247 : vector<4x96xf32>
    %249 = arith.truncf %203 : vector<4x32xf32> to vector<4x32xbf16>
    %cst_57 = arith.constant dense<0.000000e+00> : vector<4x96xf32>
    %250 = tpu.matmul %249, %2, %cst_57 {dimension_numbers = #tpu.dot_dimension_numbers<[1], [0], [0], [1], [0, 0, 1, 1], [], []>} : vector<4x32xbf16>, vector<32x96xbf16>, vector<4x96xf32> -> vector<4x96xf32>
    %251 = vector.extract_strided_slice %248 {offsets = [0, 0], sizes = [4, 32], strides = [1, 1]} : vector<4x96xf32> to vector<4x32xf32>
    %252 = vector.extract_strided_slice %250 {offsets = [0, 0], sizes = [4, 32], strides = [1, 1]} : vector<4x96xf32> to vector<4x32xf32>
    %253 = arith.addf %251, %252 : vector<4x32xf32>
    %254 = arith.negf %253 : vector<4x32xf32>
    %255 = math.exp %254 : vector<4x32xf32>
    %cst_58 = arith.constant 1.000000e+00 : f32
    %256 = vector.broadcast %cst_58 : f32 to vector<4x32xf32>
    %257 = arith.addf %256, %255 : vector<4x32xf32>
    %258 = arith.divf %256, %257 : vector<4x32xf32>
    %259 = vector.extract_strided_slice %248 {offsets = [0, 32], sizes = [4, 32], strides = [1, 1]} : vector<4x96xf32> to vector<4x32xf32>
    %260 = vector.extract_strided_slice %250 {offsets = [0, 32], sizes = [4, 32], strides = [1, 1]} : vector<4x96xf32> to vector<4x32xf32>
    %261 = arith.addf %259, %260 : vector<4x32xf32>
    %262 = arith.negf %261 : vector<4x32xf32>
    %263 = math.exp %262 : vector<4x32xf32>
    %cst_59 = arith.constant 1.000000e+00 : f32
    %264 = vector.broadcast %cst_59 : f32 to vector<4x32xf32>
    %265 = arith.addf %264, %263 : vector<4x32xf32>
    %266 = arith.divf %264, %265 : vector<4x32xf32>
    %267 = vector.extract_strided_slice %248 {offsets = [0, 64], sizes = [4, 32], strides = [1, 1]} : vector<4x96xf32> to vector<4x32xf32>
    %268 = vector.extract_strided_slice %250 {offsets = [0, 64], sizes = [4, 32], strides = [1, 1]} : vector<4x96xf32> to vector<4x32xf32>
    %269 = vector.broadcast %4 : vector<1x32xf32> to vector<4x32xf32>
    %270 = arith.addf %268, %269 : vector<4x32xf32>
    %271 = arith.mulf %258, %270 : vector<4x32xf32>
    %272 = arith.addf %267, %271 : vector<4x32xf32>
    %273 = math.tanh %272 : vector<4x32xf32>
    %cst_60 = arith.constant 1.000000e+00 : f32
    %274 = vector.broadcast %cst_60 : f32 to vector<4x32xf32>
    %275 = arith.subf %274, %266 : vector<4x32xf32>
    %276 = arith.mulf %275, %273 : vector<4x32xf32>
    %277 = arith.mulf %266, %203 : vector<4x32xf32>
    %278 = arith.addf %276, %277 : vector<4x32xf32>
    %279 = arith.select %245, %278, %203 : vector<4x32xi1>, vector<4x32xf32>
    %280 = arith.truncf %279 : vector<4x32xf32> to vector<4x32xbf16>
    %cst_61 = arith.constant dense<0.000000e+00> : vector<4x96xf32>
    %281 = tpu.matmul %280, %5, %cst_61 {dimension_numbers = #tpu.dot_dimension_numbers<[1], [0], [0], [1], [0, 0, 1, 1], [], []>} : vector<4x32xbf16>, vector<32x96xbf16>, vector<4x96xf32> -> vector<4x96xf32>
    %282 = vector.broadcast %7 : vector<1x96xf32> to vector<4x96xf32>
    %283 = arith.addf %281, %282 : vector<4x96xf32>
    %284 = arith.truncf %238 : vector<4x32xf32> to vector<4x32xbf16>
    %cst_62 = arith.constant dense<0.000000e+00> : vector<4x96xf32>
    %285 = tpu.matmul %284, %6, %cst_62 {dimension_numbers = #tpu.dot_dimension_numbers<[1], [0], [0], [1], [0, 0, 1, 1], [], []>} : vector<4x32xbf16>, vector<32x96xbf16>, vector<4x96xf32> -> vector<4x96xf32>
    %286 = vector.extract_strided_slice %283 {offsets = [0, 0], sizes = [4, 32], strides = [1, 1]} : vector<4x96xf32> to vector<4x32xf32>
    %287 = vector.extract_strided_slice %285 {offsets = [0, 0], sizes = [4, 32], strides = [1, 1]} : vector<4x96xf32> to vector<4x32xf32>
    %288 = arith.addf %286, %287 : vector<4x32xf32>
    %289 = arith.negf %288 : vector<4x32xf32>
    %290 = math.exp %289 : vector<4x32xf32>
    %cst_63 = arith.constant 1.000000e+00 : f32
    %291 = vector.broadcast %cst_63 : f32 to vector<4x32xf32>
    %292 = arith.addf %291, %290 : vector<4x32xf32>
    %293 = arith.divf %291, %292 : vector<4x32xf32>
    %294 = vector.extract_strided_slice %283 {offsets = [0, 32], sizes = [4, 32], strides = [1, 1]} : vector<4x96xf32> to vector<4x32xf32>
    %295 = vector.extract_strided_slice %285 {offsets = [0, 32], sizes = [4, 32], strides = [1, 1]} : vector<4x96xf32> to vector<4x32xf32>
    %296 = arith.addf %294, %295 : vector<4x32xf32>
    %297 = arith.negf %296 : vector<4x32xf32>
    %298 = math.exp %297 : vector<4x32xf32>
    %cst_64 = arith.constant 1.000000e+00 : f32
    %299 = vector.broadcast %cst_64 : f32 to vector<4x32xf32>
    %300 = arith.addf %299, %298 : vector<4x32xf32>
    %301 = arith.divf %299, %300 : vector<4x32xf32>
    %302 = vector.extract_strided_slice %283 {offsets = [0, 64], sizes = [4, 32], strides = [1, 1]} : vector<4x96xf32> to vector<4x32xf32>
    %303 = vector.extract_strided_slice %285 {offsets = [0, 64], sizes = [4, 32], strides = [1, 1]} : vector<4x96xf32> to vector<4x32xf32>
    %304 = vector.broadcast %8 : vector<1x32xf32> to vector<4x32xf32>
    %305 = arith.addf %303, %304 : vector<4x32xf32>
    %306 = arith.mulf %293, %305 : vector<4x32xf32>
    %307 = arith.addf %302, %306 : vector<4x32xf32>
    %308 = math.tanh %307 : vector<4x32xf32>
    %cst_65 = arith.constant 1.000000e+00 : f32
    %309 = vector.broadcast %cst_65 : f32 to vector<4x32xf32>
    %310 = arith.subf %309, %301 : vector<4x32xf32>
    %311 = arith.mulf %310, %308 : vector<4x32xf32>
    %312 = arith.mulf %301, %238 : vector<4x32xf32>
    %313 = arith.addf %311, %312 : vector<4x32xf32>
    %314 = arith.select %245, %313, %238 : vector<4x32xi1>, vector<4x32xf32>
    %c4_i32 = arith.constant 4 : i32
    %315 = arith.index_cast %c4_i32 : i32 to index
    %c0_66 = arith.constant 0 : index
    %c0_67 = arith.constant 0 : index
    %316 = vector.load %arg1[%315, %c0_66, %c0_67] : memref<8x4x32xbf16, #tpu.memory_space<vmem>>, vector<1x4x32xbf16>
    %317 = vector.shape_cast %316 : vector<1x4x32xbf16> to vector<4x32xbf16>
    %318 = vector.broadcast %c4_i32 : i32 to vector<4x1xi32>
    %319 = arith.cmpi sgt, %0, %318 : vector<4x1xi32>
    %320 = vector.shape_cast %319 : vector<4x1xi1> to vector<4x1xi1>
    %321 = vector.broadcast %320 : vector<4x1xi1> to vector<4x32xi1>
    %cst_68 = arith.constant dense<0.000000e+00> : vector<4x96xf32>
    %322 = tpu.matmul %317, %1, %cst_68 {dimension_numbers = #tpu.dot_dimension_numbers<[1], [0], [0], [1], [0, 0, 1, 1], [], []>} : vector<4x32xbf16>, vector<32x96xbf16>, vector<4x96xf32> -> vector<4x96xf32>
    %323 = vector.broadcast %3 : vector<1x96xf32> to vector<4x96xf32>
    %324 = arith.addf %322, %323 : vector<4x96xf32>
    %325 = arith.truncf %279 : vector<4x32xf32> to vector<4x32xbf16>
    %cst_69 = arith.constant dense<0.000000e+00> : vector<4x96xf32>
    %326 = tpu.matmul %325, %2, %cst_69 {dimension_numbers = #tpu.dot_dimension_numbers<[1], [0], [0], [1], [0, 0, 1, 1], [], []>} : vector<4x32xbf16>, vector<32x96xbf16>, vector<4x96xf32> -> vector<4x96xf32>
    %327 = vector.extract_strided_slice %324 {offsets = [0, 0], sizes = [4, 32], strides = [1, 1]} : vector<4x96xf32> to vector<4x32xf32>
    %328 = vector.extract_strided_slice %326 {offsets = [0, 0], sizes = [4, 32], strides = [1, 1]} : vector<4x96xf32> to vector<4x32xf32>
    %329 = arith.addf %327, %328 : vector<4x32xf32>
    %330 = arith.negf %329 : vector<4x32xf32>
    %331 = math.exp %330 : vector<4x32xf32>
    %cst_70 = arith.constant 1.000000e+00 : f32
    %332 = vector.broadcast %cst_70 : f32 to vector<4x32xf32>
    %333 = arith.addf %332, %331 : vector<4x32xf32>
    %334 = arith.divf %332, %333 : vector<4x32xf32>
    %335 = vector.extract_strided_slice %324 {offsets = [0, 32], sizes = [4, 32], strides = [1, 1]} : vector<4x96xf32> to vector<4x32xf32>
    %336 = vector.extract_strided_slice %326 {offsets = [0, 32], sizes = [4, 32], strides = [1, 1]} : vector<4x96xf32> to vector<4x32xf32>
    %337 = arith.addf %335, %336 : vector<4x32xf32>
    %338 = arith.negf %337 : vector<4x32xf32>
    %339 = math.exp %338 : vector<4x32xf32>
    %cst_71 = arith.constant 1.000000e+00 : f32
    %340 = vector.broadcast %cst_71 : f32 to vector<4x32xf32>
    %341 = arith.addf %340, %339 : vector<4x32xf32>
    %342 = arith.divf %340, %341 : vector<4x32xf32>
    %343 = vector.extract_strided_slice %324 {offsets = [0, 64], sizes = [4, 32], strides = [1, 1]} : vector<4x96xf32> to vector<4x32xf32>
    %344 = vector.extract_strided_slice %326 {offsets = [0, 64], sizes = [4, 32], strides = [1, 1]} : vector<4x96xf32> to vector<4x32xf32>
    %345 = vector.broadcast %4 : vector<1x32xf32> to vector<4x32xf32>
    %346 = arith.addf %344, %345 : vector<4x32xf32>
    %347 = arith.mulf %334, %346 : vector<4x32xf32>
    %348 = arith.addf %343, %347 : vector<4x32xf32>
    %349 = math.tanh %348 : vector<4x32xf32>
    %cst_72 = arith.constant 1.000000e+00 : f32
    %350 = vector.broadcast %cst_72 : f32 to vector<4x32xf32>
    %351 = arith.subf %350, %342 : vector<4x32xf32>
    %352 = arith.mulf %351, %349 : vector<4x32xf32>
    %353 = arith.mulf %342, %279 : vector<4x32xf32>
    %354 = arith.addf %352, %353 : vector<4x32xf32>
    %355 = arith.select %321, %354, %279 : vector<4x32xi1>, vector<4x32xf32>
    %356 = arith.truncf %355 : vector<4x32xf32> to vector<4x32xbf16>
    %cst_73 = arith.constant dense<0.000000e+00> : vector<4x96xf32>
    %357 = tpu.matmul %356, %5, %cst_73 {dimension_numbers = #tpu.dot_dimension_numbers<[1], [0], [0], [1], [0, 0, 1, 1], [], []>} : vector<4x32xbf16>, vector<32x96xbf16>, vector<4x96xf32> -> vector<4x96xf32>
    %358 = vector.broadcast %7 : vector<1x96xf32> to vector<4x96xf32>
    %359 = arith.addf %357, %358 : vector<4x96xf32>
    %360 = arith.truncf %314 : vector<4x32xf32> to vector<4x32xbf16>
    %cst_74 = arith.constant dense<0.000000e+00> : vector<4x96xf32>
    %361 = tpu.matmul %360, %6, %cst_74 {dimension_numbers = #tpu.dot_dimension_numbers<[1], [0], [0], [1], [0, 0, 1, 1], [], []>} : vector<4x32xbf16>, vector<32x96xbf16>, vector<4x96xf32> -> vector<4x96xf32>
    %362 = vector.extract_strided_slice %359 {offsets = [0, 0], sizes = [4, 32], strides = [1, 1]} : vector<4x96xf32> to vector<4x32xf32>
    %363 = vector.extract_strided_slice %361 {offsets = [0, 0], sizes = [4, 32], strides = [1, 1]} : vector<4x96xf32> to vector<4x32xf32>
    %364 = arith.addf %362, %363 : vector<4x32xf32>
    %365 = arith.negf %364 : vector<4x32xf32>
    %366 = math.exp %365 : vector<4x32xf32>
    %cst_75 = arith.constant 1.000000e+00 : f32
    %367 = vector.broadcast %cst_75 : f32 to vector<4x32xf32>
    %368 = arith.addf %367, %366 : vector<4x32xf32>
    %369 = arith.divf %367, %368 : vector<4x32xf32>
    %370 = vector.extract_strided_slice %359 {offsets = [0, 32], sizes = [4, 32], strides = [1, 1]} : vector<4x96xf32> to vector<4x32xf32>
    %371 = vector.extract_strided_slice %361 {offsets = [0, 32], sizes = [4, 32], strides = [1, 1]} : vector<4x96xf32> to vector<4x32xf32>
    %372 = arith.addf %370, %371 : vector<4x32xf32>
    %373 = arith.negf %372 : vector<4x32xf32>
    %374 = math.exp %373 : vector<4x32xf32>
    %cst_76 = arith.constant 1.000000e+00 : f32
    %375 = vector.broadcast %cst_76 : f32 to vector<4x32xf32>
    %376 = arith.addf %375, %374 : vector<4x32xf32>
    %377 = arith.divf %375, %376 : vector<4x32xf32>
    %378 = vector.extract_strided_slice %359 {offsets = [0, 64], sizes = [4, 32], strides = [1, 1]} : vector<4x96xf32> to vector<4x32xf32>
    %379 = vector.extract_strided_slice %361 {offsets = [0, 64], sizes = [4, 32], strides = [1, 1]} : vector<4x96xf32> to vector<4x32xf32>
    %380 = vector.broadcast %8 : vector<1x32xf32> to vector<4x32xf32>
    %381 = arith.addf %379, %380 : vector<4x32xf32>
    %382 = arith.mulf %369, %381 : vector<4x32xf32>
    %383 = arith.addf %378, %382 : vector<4x32xf32>
    %384 = math.tanh %383 : vector<4x32xf32>
    %cst_77 = arith.constant 1.000000e+00 : f32
    %385 = vector.broadcast %cst_77 : f32 to vector<4x32xf32>
    %386 = arith.subf %385, %377 : vector<4x32xf32>
    %387 = arith.mulf %386, %384 : vector<4x32xf32>
    %388 = arith.mulf %377, %314 : vector<4x32xf32>
    %389 = arith.addf %387, %388 : vector<4x32xf32>
    %390 = arith.select %321, %389, %314 : vector<4x32xi1>, vector<4x32xf32>
    %c5_i32 = arith.constant 5 : i32
    %391 = arith.index_cast %c5_i32 : i32 to index
    %c0_78 = arith.constant 0 : index
    %c0_79 = arith.constant 0 : index
    %392 = vector.load %arg1[%391, %c0_78, %c0_79] : memref<8x4x32xbf16, #tpu.memory_space<vmem>>, vector<1x4x32xbf16>
    %393 = vector.shape_cast %392 : vector<1x4x32xbf16> to vector<4x32xbf16>
    %394 = vector.broadcast %c5_i32 : i32 to vector<4x1xi32>
    %395 = arith.cmpi sgt, %0, %394 : vector<4x1xi32>
    %396 = vector.shape_cast %395 : vector<4x1xi1> to vector<4x1xi1>
    %397 = vector.broadcast %396 : vector<4x1xi1> to vector<4x32xi1>
    %cst_80 = arith.constant dense<0.000000e+00> : vector<4x96xf32>
    %398 = tpu.matmul %393, %1, %cst_80 {dimension_numbers = #tpu.dot_dimension_numbers<[1], [0], [0], [1], [0, 0, 1, 1], [], []>} : vector<4x32xbf16>, vector<32x96xbf16>, vector<4x96xf32> -> vector<4x96xf32>
    %399 = vector.broadcast %3 : vector<1x96xf32> to vector<4x96xf32>
    %400 = arith.addf %398, %399 : vector<4x96xf32>
    %401 = arith.truncf %355 : vector<4x32xf32> to vector<4x32xbf16>
    %cst_81 = arith.constant dense<0.000000e+00> : vector<4x96xf32>
    %402 = tpu.matmul %401, %2, %cst_81 {dimension_numbers = #tpu.dot_dimension_numbers<[1], [0], [0], [1], [0, 0, 1, 1], [], []>} : vector<4x32xbf16>, vector<32x96xbf16>, vector<4x96xf32> -> vector<4x96xf32>
    %403 = vector.extract_strided_slice %400 {offsets = [0, 0], sizes = [4, 32], strides = [1, 1]} : vector<4x96xf32> to vector<4x32xf32>
    %404 = vector.extract_strided_slice %402 {offsets = [0, 0], sizes = [4, 32], strides = [1, 1]} : vector<4x96xf32> to vector<4x32xf32>
    %405 = arith.addf %403, %404 : vector<4x32xf32>
    %406 = arith.negf %405 : vector<4x32xf32>
    %407 = math.exp %406 : vector<4x32xf32>
    %cst_82 = arith.constant 1.000000e+00 : f32
    %408 = vector.broadcast %cst_82 : f32 to vector<4x32xf32>
    %409 = arith.addf %408, %407 : vector<4x32xf32>
    %410 = arith.divf %408, %409 : vector<4x32xf32>
    %411 = vector.extract_strided_slice %400 {offsets = [0, 32], sizes = [4, 32], strides = [1, 1]} : vector<4x96xf32> to vector<4x32xf32>
    %412 = vector.extract_strided_slice %402 {offsets = [0, 32], sizes = [4, 32], strides = [1, 1]} : vector<4x96xf32> to vector<4x32xf32>
    %413 = arith.addf %411, %412 : vector<4x32xf32>
    %414 = arith.negf %413 : vector<4x32xf32>
    %415 = math.exp %414 : vector<4x32xf32>
    %cst_83 = arith.constant 1.000000e+00 : f32
    %416 = vector.broadcast %cst_83 : f32 to vector<4x32xf32>
    %417 = arith.addf %416, %415 : vector<4x32xf32>
    %418 = arith.divf %416, %417 : vector<4x32xf32>
    %419 = vector.extract_strided_slice %400 {offsets = [0, 64], sizes = [4, 32], strides = [1, 1]} : vector<4x96xf32> to vector<4x32xf32>
    %420 = vector.extract_strided_slice %402 {offsets = [0, 64], sizes = [4, 32], strides = [1, 1]} : vector<4x96xf32> to vector<4x32xf32>
    %421 = vector.broadcast %4 : vector<1x32xf32> to vector<4x32xf32>
    %422 = arith.addf %420, %421 : vector<4x32xf32>
    %423 = arith.mulf %410, %422 : vector<4x32xf32>
    %424 = arith.addf %419, %423 : vector<4x32xf32>
    %425 = math.tanh %424 : vector<4x32xf32>
    %cst_84 = arith.constant 1.000000e+00 : f32
    %426 = vector.broadcast %cst_84 : f32 to vector<4x32xf32>
    %427 = arith.subf %426, %418 : vector<4x32xf32>
    %428 = arith.mulf %427, %425 : vector<4x32xf32>
    %429 = arith.mulf %418, %355 : vector<4x32xf32>
    %430 = arith.addf %428, %429 : vector<4x32xf32>
    %431 = arith.select %397, %430, %355 : vector<4x32xi1>, vector<4x32xf32>
    %432 = arith.truncf %431 : vector<4x32xf32> to vector<4x32xbf16>
    %cst_85 = arith.constant dense<0.000000e+00> : vector<4x96xf32>
    %433 = tpu.matmul %432, %5, %cst_85 {dimension_numbers = #tpu.dot_dimension_numbers<[1], [0], [0], [1], [0, 0, 1, 1], [], []>} : vector<4x32xbf16>, vector<32x96xbf16>, vector<4x96xf32> -> vector<4x96xf32>
    %434 = vector.broadcast %7 : vector<1x96xf32> to vector<4x96xf32>
    %435 = arith.addf %433, %434 : vector<4x96xf32>
    %436 = arith.truncf %390 : vector<4x32xf32> to vector<4x32xbf16>
    %cst_86 = arith.constant dense<0.000000e+00> : vector<4x96xf32>
    %437 = tpu.matmul %436, %6, %cst_86 {dimension_numbers = #tpu.dot_dimension_numbers<[1], [0], [0], [1], [0, 0, 1, 1], [], []>} : vector<4x32xbf16>, vector<32x96xbf16>, vector<4x96xf32> -> vector<4x96xf32>
    %438 = vector.extract_strided_slice %435 {offsets = [0, 0], sizes = [4, 32], strides = [1, 1]} : vector<4x96xf32> to vector<4x32xf32>
    %439 = vector.extract_strided_slice %437 {offsets = [0, 0], sizes = [4, 32], strides = [1, 1]} : vector<4x96xf32> to vector<4x32xf32>
    %440 = arith.addf %438, %439 : vector<4x32xf32>
    %441 = arith.negf %440 : vector<4x32xf32>
    %442 = math.exp %441 : vector<4x32xf32>
    %cst_87 = arith.constant 1.000000e+00 : f32
    %443 = vector.broadcast %cst_87 : f32 to vector<4x32xf32>
    %444 = arith.addf %443, %442 : vector<4x32xf32>
    %445 = arith.divf %443, %444 : vector<4x32xf32>
    %446 = vector.extract_strided_slice %435 {offsets = [0, 32], sizes = [4, 32], strides = [1, 1]} : vector<4x96xf32> to vector<4x32xf32>
    %447 = vector.extract_strided_slice %437 {offsets = [0, 32], sizes = [4, 32], strides = [1, 1]} : vector<4x96xf32> to vector<4x32xf32>
    %448 = arith.addf %446, %447 : vector<4x32xf32>
    %449 = arith.negf %448 : vector<4x32xf32>
    %450 = math.exp %449 : vector<4x32xf32>
    %cst_88 = arith.constant 1.000000e+00 : f32
    %451 = vector.broadcast %cst_88 : f32 to vector<4x32xf32>
    %452 = arith.addf %451, %450 : vector<4x32xf32>
    %453 = arith.divf %451, %452 : vector<4x32xf32>
    %454 = vector.extract_strided_slice %435 {offsets = [0, 64], sizes = [4, 32], strides = [1, 1]} : vector<4x96xf32> to vector<4x32xf32>
    %455 = vector.extract_strided_slice %437 {offsets = [0, 64], sizes = [4, 32], strides = [1, 1]} : vector<4x96xf32> to vector<4x32xf32>
    %456 = vector.broadcast %8 : vector<1x32xf32> to vector<4x32xf32>
    %457 = arith.addf %455, %456 : vector<4x32xf32>
    %458 = arith.mulf %445, %457 : vector<4x32xf32>
    %459 = arith.addf %454, %458 : vector<4x32xf32>
    %460 = math.tanh %459 : vector<4x32xf32>
    %cst_89 = arith.constant 1.000000e+00 : f32
    %461 = vector.broadcast %cst_89 : f32 to vector<4x32xf32>
    %462 = arith.subf %461, %453 : vector<4x32xf32>
    %463 = arith.mulf %462, %460 : vector<4x32xf32>
    %464 = arith.mulf %453, %390 : vector<4x32xf32>
    %465 = arith.addf %463, %464 : vector<4x32xf32>
    %466 = arith.select %397, %465, %390 : vector<4x32xi1>, vector<4x32xf32>
    %c6_i32 = arith.constant 6 : i32
    %467 = arith.index_cast %c6_i32 : i32 to index
    %c0_90 = arith.constant 0 : index
    %c0_91 = arith.constant 0 : index
    %468 = vector.load %arg1[%467, %c0_90, %c0_91] : memref<8x4x32xbf16, #tpu.memory_space<vmem>>, vector<1x4x32xbf16>
    %469 = vector.shape_cast %468 : vector<1x4x32xbf16> to vector<4x32xbf16>
    %470 = vector.broadcast %c6_i32 : i32 to vector<4x1xi32>
    %471 = arith.cmpi sgt, %0, %470 : vector<4x1xi32>
    %472 = vector.shape_cast %471 : vector<4x1xi1> to vector<4x1xi1>
    %473 = vector.broadcast %472 : vector<4x1xi1> to vector<4x32xi1>
    %cst_92 = arith.constant dense<0.000000e+00> : vector<4x96xf32>
    %474 = tpu.matmul %469, %1, %cst_92 {dimension_numbers = #tpu.dot_dimension_numbers<[1], [0], [0], [1], [0, 0, 1, 1], [], []>} : vector<4x32xbf16>, vector<32x96xbf16>, vector<4x96xf32> -> vector<4x96xf32>
    %475 = vector.broadcast %3 : vector<1x96xf32> to vector<4x96xf32>
    %476 = arith.addf %474, %475 : vector<4x96xf32>
    %477 = arith.truncf %431 : vector<4x32xf32> to vector<4x32xbf16>
    %cst_93 = arith.constant dense<0.000000e+00> : vector<4x96xf32>
    %478 = tpu.matmul %477, %2, %cst_93 {dimension_numbers = #tpu.dot_dimension_numbers<[1], [0], [0], [1], [0, 0, 1, 1], [], []>} : vector<4x32xbf16>, vector<32x96xbf16>, vector<4x96xf32> -> vector<4x96xf32>
    %479 = vector.extract_strided_slice %476 {offsets = [0, 0], sizes = [4, 32], strides = [1, 1]} : vector<4x96xf32> to vector<4x32xf32>
    %480 = vector.extract_strided_slice %478 {offsets = [0, 0], sizes = [4, 32], strides = [1, 1]} : vector<4x96xf32> to vector<4x32xf32>
    %481 = arith.addf %479, %480 : vector<4x32xf32>
    %482 = arith.negf %481 : vector<4x32xf32>
    %483 = math.exp %482 : vector<4x32xf32>
    %cst_94 = arith.constant 1.000000e+00 : f32
    %484 = vector.broadcast %cst_94 : f32 to vector<4x32xf32>
    %485 = arith.addf %484, %483 : vector<4x32xf32>
    %486 = arith.divf %484, %485 : vector<4x32xf32>
    %487 = vector.extract_strided_slice %476 {offsets = [0, 32], sizes = [4, 32], strides = [1, 1]} : vector<4x96xf32> to vector<4x32xf32>
    %488 = vector.extract_strided_slice %478 {offsets = [0, 32], sizes = [4, 32], strides = [1, 1]} : vector<4x96xf32> to vector<4x32xf32>
    %489 = arith.addf %487, %488 : vector<4x32xf32>
    %490 = arith.negf %489 : vector<4x32xf32>
    %491 = math.exp %490 : vector<4x32xf32>
    %cst_95 = arith.constant 1.000000e+00 : f32
    %492 = vector.broadcast %cst_95 : f32 to vector<4x32xf32>
    %493 = arith.addf %492, %491 : vector<4x32xf32>
    %494 = arith.divf %492, %493 : vector<4x32xf32>
    %495 = vector.extract_strided_slice %476 {offsets = [0, 64], sizes = [4, 32], strides = [1, 1]} : vector<4x96xf32> to vector<4x32xf32>
    %496 = vector.extract_strided_slice %478 {offsets = [0, 64], sizes = [4, 32], strides = [1, 1]} : vector<4x96xf32> to vector<4x32xf32>
    %497 = vector.broadcast %4 : vector<1x32xf32> to vector<4x32xf32>
    %498 = arith.addf %496, %497 : vector<4x32xf32>
    %499 = arith.mulf %486, %498 : vector<4x32xf32>
    %500 = arith.addf %495, %499 : vector<4x32xf32>
    %501 = math.tanh %500 : vector<4x32xf32>
    %cst_96 = arith.constant 1.000000e+00 : f32
    %502 = vector.broadcast %cst_96 : f32 to vector<4x32xf32>
    %503 = arith.subf %502, %494 : vector<4x32xf32>
    %504 = arith.mulf %503, %501 : vector<4x32xf32>
    %505 = arith.mulf %494, %431 : vector<4x32xf32>
    %506 = arith.addf %504, %505 : vector<4x32xf32>
    %507 = arith.select %473, %506, %431 : vector<4x32xi1>, vector<4x32xf32>
    %508 = arith.truncf %507 : vector<4x32xf32> to vector<4x32xbf16>
    %cst_97 = arith.constant dense<0.000000e+00> : vector<4x96xf32>
    %509 = tpu.matmul %508, %5, %cst_97 {dimension_numbers = #tpu.dot_dimension_numbers<[1], [0], [0], [1], [0, 0, 1, 1], [], []>} : vector<4x32xbf16>, vector<32x96xbf16>, vector<4x96xf32> -> vector<4x96xf32>
    %510 = vector.broadcast %7 : vector<1x96xf32> to vector<4x96xf32>
    %511 = arith.addf %509, %510 : vector<4x96xf32>
    %512 = arith.truncf %466 : vector<4x32xf32> to vector<4x32xbf16>
    %cst_98 = arith.constant dense<0.000000e+00> : vector<4x96xf32>
    %513 = tpu.matmul %512, %6, %cst_98 {dimension_numbers = #tpu.dot_dimension_numbers<[1], [0], [0], [1], [0, 0, 1, 1], [], []>} : vector<4x32xbf16>, vector<32x96xbf16>, vector<4x96xf32> -> vector<4x96xf32>
    %514 = vector.extract_strided_slice %511 {offsets = [0, 0], sizes = [4, 32], strides = [1, 1]} : vector<4x96xf32> to vector<4x32xf32>
    %515 = vector.extract_strided_slice %513 {offsets = [0, 0], sizes = [4, 32], strides = [1, 1]} : vector<4x96xf32> to vector<4x32xf32>
    %516 = arith.addf %514, %515 : vector<4x32xf32>
    %517 = arith.negf %516 : vector<4x32xf32>
    %518 = math.exp %517 : vector<4x32xf32>
    %cst_99 = arith.constant 1.000000e+00 : f32
    %519 = vector.broadcast %cst_99 : f32 to vector<4x32xf32>
    %520 = arith.addf %519, %518 : vector<4x32xf32>
    %521 = arith.divf %519, %520 : vector<4x32xf32>
    %522 = vector.extract_strided_slice %511 {offsets = [0, 32], sizes = [4, 32], strides = [1, 1]} : vector<4x96xf32> to vector<4x32xf32>
    %523 = vector.extract_strided_slice %513 {offsets = [0, 32], sizes = [4, 32], strides = [1, 1]} : vector<4x96xf32> to vector<4x32xf32>
    %524 = arith.addf %522, %523 : vector<4x32xf32>
    %525 = arith.negf %524 : vector<4x32xf32>
    %526 = math.exp %525 : vector<4x32xf32>
    %cst_100 = arith.constant 1.000000e+00 : f32
    %527 = vector.broadcast %cst_100 : f32 to vector<4x32xf32>
    %528 = arith.addf %527, %526 : vector<4x32xf32>
    %529 = arith.divf %527, %528 : vector<4x32xf32>
    %530 = vector.extract_strided_slice %511 {offsets = [0, 64], sizes = [4, 32], strides = [1, 1]} : vector<4x96xf32> to vector<4x32xf32>
    %531 = vector.extract_strided_slice %513 {offsets = [0, 64], sizes = [4, 32], strides = [1, 1]} : vector<4x96xf32> to vector<4x32xf32>
    %532 = vector.broadcast %8 : vector<1x32xf32> to vector<4x32xf32>
    %533 = arith.addf %531, %532 : vector<4x32xf32>
    %534 = arith.mulf %521, %533 : vector<4x32xf32>
    %535 = arith.addf %530, %534 : vector<4x32xf32>
    %536 = math.tanh %535 : vector<4x32xf32>
    %cst_101 = arith.constant 1.000000e+00 : f32
    %537 = vector.broadcast %cst_101 : f32 to vector<4x32xf32>
    %538 = arith.subf %537, %529 : vector<4x32xf32>
    %539 = arith.mulf %538, %536 : vector<4x32xf32>
    %540 = arith.mulf %529, %466 : vector<4x32xf32>
    %541 = arith.addf %539, %540 : vector<4x32xf32>
    %542 = arith.select %473, %541, %466 : vector<4x32xi1>, vector<4x32xf32>
    %c7_i32 = arith.constant 7 : i32
    %543 = arith.index_cast %c7_i32 : i32 to index
    %c0_102 = arith.constant 0 : index
    %c0_103 = arith.constant 0 : index
    %544 = vector.load %arg1[%543, %c0_102, %c0_103] : memref<8x4x32xbf16, #tpu.memory_space<vmem>>, vector<1x4x32xbf16>
    %545 = vector.shape_cast %544 : vector<1x4x32xbf16> to vector<4x32xbf16>
    %546 = vector.broadcast %c7_i32 : i32 to vector<4x1xi32>
    %547 = arith.cmpi sgt, %0, %546 : vector<4x1xi32>
    %548 = vector.shape_cast %547 : vector<4x1xi1> to vector<4x1xi1>
    %549 = vector.broadcast %548 : vector<4x1xi1> to vector<4x32xi1>
    %cst_104 = arith.constant dense<0.000000e+00> : vector<4x96xf32>
    %550 = tpu.matmul %545, %1, %cst_104 {dimension_numbers = #tpu.dot_dimension_numbers<[1], [0], [0], [1], [0, 0, 1, 1], [], []>} : vector<4x32xbf16>, vector<32x96xbf16>, vector<4x96xf32> -> vector<4x96xf32>
    %551 = vector.broadcast %3 : vector<1x96xf32> to vector<4x96xf32>
    %552 = arith.addf %550, %551 : vector<4x96xf32>
    %553 = arith.truncf %507 : vector<4x32xf32> to vector<4x32xbf16>
    %cst_105 = arith.constant dense<0.000000e+00> : vector<4x96xf32>
    %554 = tpu.matmul %553, %2, %cst_105 {dimension_numbers = #tpu.dot_dimension_numbers<[1], [0], [0], [1], [0, 0, 1, 1], [], []>} : vector<4x32xbf16>, vector<32x96xbf16>, vector<4x96xf32> -> vector<4x96xf32>
    %555 = vector.extract_strided_slice %552 {offsets = [0, 0], sizes = [4, 32], strides = [1, 1]} : vector<4x96xf32> to vector<4x32xf32>
    %556 = vector.extract_strided_slice %554 {offsets = [0, 0], sizes = [4, 32], strides = [1, 1]} : vector<4x96xf32> to vector<4x32xf32>
    %557 = arith.addf %555, %556 : vector<4x32xf32>
    %558 = arith.negf %557 : vector<4x32xf32>
    %559 = math.exp %558 : vector<4x32xf32>
    %cst_106 = arith.constant 1.000000e+00 : f32
    %560 = vector.broadcast %cst_106 : f32 to vector<4x32xf32>
    %561 = arith.addf %560, %559 : vector<4x32xf32>
    %562 = arith.divf %560, %561 : vector<4x32xf32>
    %563 = vector.extract_strided_slice %552 {offsets = [0, 32], sizes = [4, 32], strides = [1, 1]} : vector<4x96xf32> to vector<4x32xf32>
    %564 = vector.extract_strided_slice %554 {offsets = [0, 32], sizes = [4, 32], strides = [1, 1]} : vector<4x96xf32> to vector<4x32xf32>
    %565 = arith.addf %563, %564 : vector<4x32xf32>
    %566 = arith.negf %565 : vector<4x32xf32>
    %567 = math.exp %566 : vector<4x32xf32>
    %cst_107 = arith.constant 1.000000e+00 : f32
    %568 = vector.broadcast %cst_107 : f32 to vector<4x32xf32>
    %569 = arith.addf %568, %567 : vector<4x32xf32>
    %570 = arith.divf %568, %569 : vector<4x32xf32>
    %571 = vector.extract_strided_slice %552 {offsets = [0, 64], sizes = [4, 32], strides = [1, 1]} : vector<4x96xf32> to vector<4x32xf32>
    %572 = vector.extract_strided_slice %554 {offsets = [0, 64], sizes = [4, 32], strides = [1, 1]} : vector<4x96xf32> to vector<4x32xf32>
    %573 = vector.broadcast %4 : vector<1x32xf32> to vector<4x32xf32>
    %574 = arith.addf %572, %573 : vector<4x32xf32>
    %575 = arith.mulf %562, %574 : vector<4x32xf32>
    %576 = arith.addf %571, %575 : vector<4x32xf32>
    %577 = math.tanh %576 : vector<4x32xf32>
    %cst_108 = arith.constant 1.000000e+00 : f32
    %578 = vector.broadcast %cst_108 : f32 to vector<4x32xf32>
    %579 = arith.subf %578, %570 : vector<4x32xf32>
    %580 = arith.mulf %579, %577 : vector<4x32xf32>
    %581 = arith.mulf %570, %507 : vector<4x32xf32>
    %582 = arith.addf %580, %581 : vector<4x32xf32>
    %583 = arith.select %549, %582, %507 : vector<4x32xi1>, vector<4x32xf32>
    %584 = arith.truncf %583 : vector<4x32xf32> to vector<4x32xbf16>
    %cst_109 = arith.constant dense<0.000000e+00> : vector<4x96xf32>
    %585 = tpu.matmul %584, %5, %cst_109 {dimension_numbers = #tpu.dot_dimension_numbers<[1], [0], [0], [1], [0, 0, 1, 1], [], []>} : vector<4x32xbf16>, vector<32x96xbf16>, vector<4x96xf32> -> vector<4x96xf32>
    %586 = vector.broadcast %7 : vector<1x96xf32> to vector<4x96xf32>
    %587 = arith.addf %585, %586 : vector<4x96xf32>
    %588 = arith.truncf %542 : vector<4x32xf32> to vector<4x32xbf16>
    %cst_110 = arith.constant dense<0.000000e+00> : vector<4x96xf32>
    %589 = tpu.matmul %588, %6, %cst_110 {dimension_numbers = #tpu.dot_dimension_numbers<[1], [0], [0], [1], [0, 0, 1, 1], [], []>} : vector<4x32xbf16>, vector<32x96xbf16>, vector<4x96xf32> -> vector<4x96xf32>
    %590 = vector.extract_strided_slice %587 {offsets = [0, 0], sizes = [4, 32], strides = [1, 1]} : vector<4x96xf32> to vector<4x32xf32>
    %591 = vector.extract_strided_slice %589 {offsets = [0, 0], sizes = [4, 32], strides = [1, 1]} : vector<4x96xf32> to vector<4x32xf32>
    %592 = arith.addf %590, %591 : vector<4x32xf32>
    %593 = arith.negf %592 : vector<4x32xf32>
    %594 = math.exp %593 : vector<4x32xf32>
    %cst_111 = arith.constant 1.000000e+00 : f32
    %595 = vector.broadcast %cst_111 : f32 to vector<4x32xf32>
    %596 = arith.addf %595, %594 : vector<4x32xf32>
    %597 = arith.divf %595, %596 : vector<4x32xf32>
    %598 = vector.extract_strided_slice %587 {offsets = [0, 32], sizes = [4, 32], strides = [1, 1]} : vector<4x96xf32> to vector<4x32xf32>
    %599 = vector.extract_strided_slice %589 {offsets = [0, 32], sizes = [4, 32], strides = [1, 1]} : vector<4x96xf32> to vector<4x32xf32>
    %600 = arith.addf %598, %599 : vector<4x32xf32>
    %601 = arith.negf %600 : vector<4x32xf32>
    %602 = math.exp %601 : vector<4x32xf32>
    %cst_112 = arith.constant 1.000000e+00 : f32
    %603 = vector.broadcast %cst_112 : f32 to vector<4x32xf32>
    %604 = arith.addf %603, %602 : vector<4x32xf32>
    %605 = arith.divf %603, %604 : vector<4x32xf32>
    %606 = vector.extract_strided_slice %587 {offsets = [0, 64], sizes = [4, 32], strides = [1, 1]} : vector<4x96xf32> to vector<4x32xf32>
    %607 = vector.extract_strided_slice %589 {offsets = [0, 64], sizes = [4, 32], strides = [1, 1]} : vector<4x96xf32> to vector<4x32xf32>
    %608 = vector.broadcast %8 : vector<1x32xf32> to vector<4x32xf32>
    %609 = arith.addf %607, %608 : vector<4x32xf32>
    %610 = arith.mulf %597, %609 : vector<4x32xf32>
    %611 = arith.addf %606, %610 : vector<4x32xf32>
    %612 = math.tanh %611 : vector<4x32xf32>
    %cst_113 = arith.constant 1.000000e+00 : f32
    %613 = vector.broadcast %cst_113 : f32 to vector<4x32xf32>
    %614 = arith.subf %613, %605 : vector<4x32xf32>
    %615 = arith.mulf %614, %612 : vector<4x32xf32>
    %616 = arith.mulf %605, %542 : vector<4x32xf32>
    %617 = arith.addf %615, %616 : vector<4x32xf32>
    %618 = arith.select %549, %617, %542 : vector<4x32xi1>, vector<4x32xf32>
    %c8_i32 = arith.constant 8 : i32
    %c0_114 = arith.constant 0 : index
    %c0_115 = arith.constant 0 : index
    %619 = vector.load %arg10[%c0_114, %c0_115] : memref<4x32xf32, #tpu.memory_space<vmem>>, vector<4x32xf32>
    tpu.vector_store %arg10[%c0_114, %c0_115], %618 {strides = array<i32>} : memref<4x32xf32, #tpu.memory_space<vmem>>, vector<4x32xf32>,
    return
  }
}

</mosaic_0001>

<bundles_post_ra>
// kernel: rnn_pallas.1
= control target key start
LH: loop header
LB: loop body
LE: loop exit
PB: predicated region body
PF: predicated region fallthrough
CT: control target
= control target key end

     0   :  { %v2606_v0 = vmov 0.0   ;;  %vm2607_vm0 = vmmov 0   ;;  %v2608_v4 = vmov 0   ;;  %s2609_s23 = smov 64   ;;  %vm82_vm1 = vcmask 261120   ;;  %s2610_s17 = smov 96   ;;  %s3282_s2 = inlined_call_operand.vmem [shape: bf16[32,96], index: 2, kind: input, shape index: {}]   ;;  %s3283_s3 = inlined_call_operand.vmem [shape: bf16[32,96], index: 3, kind: input, shape index: {}]   ;;  %s3284_s5 = inlined_call_operand.vmem [shape: f32[1,32], index: 5, kind: input, shape index: {}]   ;;  %s3285_s1 = inlined_call_operand.vmem [shape: bf16[8,4,32], index: 1, kind: input, shape index: {}]   ;;  %s3286_s4 = inlined_call_operand.vmem [shape: f32[1,96], index: 4, kind: input, shape index: {}]   ;;  %s3287_s0 = inlined_call_operand.vmem [shape: s32[4,1], index: 0, kind: input, shape index: {}]   ;;  %s3288_s7 = inlined_call_operand.vmem [shape: bf16[32,96], index: 7, kind: input, shape index: {}]   ;;  %s3289_s6 = inlined_call_operand.vmem [shape: bf16[32,96], index: 6, kind: input, shape index: {}]   ;;  %s3290_s9 = inlined_call_operand.vmem [shape: f32[1,32], index: 9, kind: input, shape index: {}]   ;;  %s3291_s8 = inlined_call_operand.vmem [shape: f32[1,96], index: 8, kind: input, shape index: {}]   ;;  %s3292_s10 = inlined_call_operand.vmem [shape: f32[4,32], index: 10, kind: output, shape index: {}]  }
   0x1   :  { %2228 = vmatprep.subr.bf16.mxu0 %v2606_v0  ;;  %2236 = vmatprep.subr.bf16.mxu1 %v2606_v0  ;;  %v2671_v1 = vld [vmem:[%s3282_s2] sm:$0xff]   ;;  %v2686_v3 = vld [vmem:[%s3282_s2 + $0x8] sm:$0xff]  }
   0x2   :  { %v2676_v2 = vld [vmem:[%s3283_s3] sm:$0xff]   ;;  %2232 = vmatprep.mubr.msk.bf16.mxu0 %vm2607_vm0, %v2606_v0  ;;  %2240 = vmatprep.mubr.msk.bf16.mxu1 %vm2607_vm0, %v2606_v0  ;;  %v2694_v5 = vld [vmem:[%s3283_s3 + $0x8] sm:$0xff]  }
   0x3   :  { %2229 = vmatpush3.bf16.msra.mxu0 %v2671_v1  ;;  %2489 = vset.pattern.permute.xlu1 %v2608_v4  ;;  %v2074_v6 = vld [vmem:[%s3284_s5] ss:$0 sm:$0xff]  ;;  %v2741_v32 = vld [vmem:[%s3288_s7 + $0x8] sm:$0xff]   ;;  %v2083_v52 = vld [vmem:[%s3285_s1 + $0x2] sm:$0x3] }
   0x4   :  { %2237 = vmatpush3.bf16.msra.mxu1 %v2676_v2  ;;  %2230 = vmatprep.subr.bf16.mxu0 %v2606_v0  ;;  %v57_v7 = vld [vmem:[%s3285_s1] sm:$0x3]  ;;  %v2754_v35 = vld [vmem:[%s3289_s6 + $0x8] sm:$0xff]  }
   0x5   :  { %2238 = vmatprep.subr.bf16.mxu1 %v2606_v0  ;;  %2490 = vset.pattern.permute.xlu0 %v2608_v4  ;;  %v2722_v18 = vld [vmem:[%s3286_s4] ss:$0 sm:$0xff] }
   0x6   :  { %193 = vrot.lane.b32.xlu0 %v2074_v6, %s2609_s23  ;;  %v2728_v24 = vld [vmem:[%s3287_s0] sm:$0xf] }
   0x7   :  { %2231 = vmatpush3.bf16.msra.mxu0 %v2686_v3  ;;  %vm58_vm2 = vcmp.gt.s32.totalorder %v2728_v24, 0  ;;  %v2736_v31 = vld [vmem:[%s3288_s7] sm:$0xff]   ;;  %vm372_vm4 = vcmp.gt.s32.totalorder %v2728_v24, 1  ;;  %vm613_vm6 = vcmp.gt.s32.totalorder %v2728_v24, 2  ;;  %vm854_vm8 = vcmp.gt.s32.totalorder %v2728_v24, 3 }
   0x8   :  { %2239 = vmatpush3.bf16.msra.mxu1 %v2694_v5  ;;  %2244 = vmatprep.subr.bf16.mxu0 %v2606_v0  ;;  %v59_v28 = vsel %vm58_vm2, 1, %v2608_v4  ;;  %v2747_v33 = vld [vmem:[%s3289_s6] sm:$0xff]   ;;  %vm1095_vm10 = vcmp.gt.s32.totalorder %v2728_v24, 4 }
   0x9   :  { %2252 = vmatprep.subr.bf16.mxu1 %v2606_v0  ;;  %v2082_v42 = vld [vmem:[%s3290_s9] ss:$0 sm:$0xff] }
   0xa   :  { %2233 = vmatmul.mubr.msk.bf16.vlgmr.msra.gmra.mrb[0].mxu0 %vm82_vm1, %v57_v7  ;;  %v2814_v53 = vld [vmem:[%s3291_s8] ss:$0 sm:$0xff] }
   0xb   :  { %2241 = vmatmul.mubr.bf16.vlgmr.msra.gmra.mrb[0].mxu1 %v2608_v4  ;;  %2248 = vmatprep.mubr.msk.bf16.mxu0 %vm2607_vm0, %v2606_v0 }
   0xc   :  { %2256 = vmatprep.mubr.msk.bf16.mxu1 %vm2607_vm0, %v2606_v0  ;;  %2253 = vmatpush3.bf16.msra.mxu1 %v2736_v31 }
   0xd   :  { %2254 = vmatprep.subr.bf16.mxu1 %v2606_v0  ;;  %2245 = vmatpush3.bf16.msra.mxu0 %v2747_v33 }
   0xe   :  { %2246 = vmatprep.subr.bf16.mxu0 %v2606_v0 }
  0x10   :  { %2255 = vmatpush3.bf16.msra.mxu1 %v2741_v32 }
  0x11   :  { %2268 = vmatprep.subr.bf16.mxu1 %v2606_v0  ;;  %2247 = vmatpush3.bf16.msra.mxu0 %v2754_v35 }
  0x12   :  { %2260 = vmatprep.subr.bf16.mxu0 %v2606_v0 }
  0x13   :  { %2257 = vmatmul.mubr.bf16.vlgmr.msra.gmra.mrb[4].mxu1 %v2608_v4 }
  0x14   :  { %2269 = vmatpush3.bf16.msra.mxu1 %v2676_v2  ;;  %2272 = vmatprep.mubr.msk.bf16.mxu1 %vm2607_vm0, %v2606_v0 }
  0x15   :  { %2270 = vmatprep.subr.bf16.mxu1 %v2606_v0 }
  0x18   :  { %2271 = vmatpush3.bf16.msra.mxu1 %v2694_v5 }
  0x19   :  { %2284 = vmatprep.subr.bf16.mxu1 %v2606_v0 }
  0x78   :  { %v2715_v8 = vpop.permute.xlu0 %193 }
  0xdd   :  { %v120_v9 = vpop.f32.mrb[0].mxu0 }
  0xde   :  { %v175_v10 = vpop.f32.mrb[0].mxu1  ;;  %v2234_v11 = vpop.f32.mrb[1].mxu0  ;;  %v121_v19 = vadd.f32 %v2722_v18, %v120_v9 }
  0xdf   :  { %v196_v12 = vadd.f32 %v2715_v8, %v175_v10  ;;  %v2242_v13 = vpop.f32.mrb[1].mxu1  ;;  %v123_v14 = vpop.f32.mrb[2].mxu0 }
  0xe0   :  { %v178_v15 = vpop.f32.mrb[2].mxu1  ;;  %v2235_v16 = vpop.f32.mrb[3].mxu0  ;;  %v181_v20 = vadd.f32 %v175_v10, %v121_v19 }
  0xe1   :  { %198 = vrot.lane.b32.xlu0 %v196_v12, %s2609_s23  ;;  %v2243_v17 = vpop.f32.mrb[3].mxu1 }
  0xe2   :  { %v2073_v21 = vmul.f32 -1.442695, %v181_v20 }
  0xe4   :  { %2499 = vpow2.f32 %v2073_v21 }
  0xe6   :  { %v328_v45 = vpop.f32.mrb[4].mxu1 }
  0xe7   :  { %v2258_v46 = vpop.f32.mrb[5].mxu1 }
  0xe8   :  { %v331_v47 = vpop.f32.mrb[6].mxu1 }
  0xe9   :  { %v2259_v48 = vpop.f32.mrb[7].mxu1 }
  0xee   :  { %v2500_v22 = vpop.eup %2499 }
  0xef   :  { %v185_v23 = vadd.f32 1.0, %v2500_v22 }
  0xf1   :  { %2501 = vrcp.f32 %v185_v23 }
  0xfb   :  { %v2502_v25 = vpop.eup %2501 }
  0xfc   :  { %v208_v36 = vsub.f32 1.0, %v2502_v25  ;;  %v214_v39 = vmul.f32 0.0, %v2502_v25 }
 0x153   :  { %v199_v26 = vpop.permute.xlu0 %198 }
 0x154   :  { %v201_v27 = vmul.f32 %v2502_v25, %v199_v26 }
 0x156   :  { %203 = vrot.lane.b32.xlu1 %v201_v27, %s2609_s23 }
 0x15a   :  { %61 = vperm.xlu1 %2489, %v59_v28   ;;  %v373_v28 = vsel %vm372_vm4, 1, %v2608_v4 }
 0x1c8   :  { %v204_v29 = vpop.permute.xlu1 %203 }
 0x1c9   :  { %v206_v30 = vadd.f32 %v204_v29, %v121_v19 }
 0x1cb   :  { %2503 = vtanh.f32 %v206_v30 }
 0x1d5   :  { %v2504_v34 = vpop.eup %2503 }
 0x1d6   :  { %210 = vrot.lane.b32.xlu0 %v2504_v34, %s2610_s17 }
 0x1d9   :  { %v2769_v37 = vpop.permute.xlu1 %61 }
 0x1da   :  { %vm63_vm3 = vcmp.eq.s32.totalorder %v2769_v37, 1  ;;  %346 = vrot.lane.b32.xlu0 %v2082_v42, %s2609_s23 }
 0x248   :  { %v211_v38 = vpop.permute.xlu0 %210 }
 0x249   :  { %v213_v40 = vmul.f32 %v211_v38, %v208_v36 }
 0x24b   :  { %v215_v41 = vadd.f32 %v214_v39, %v213_v40 }
 0x24c   :  { %v2783_v49 = vpop.permute.xlu0 %346 }
 0x24d   :  { %v2777_v43 = vsel %vm63_vm3, %v215_v41, 0.0  ;;  %v349_v50 = vadd.f32 %v2783_v49, %v328_v45 }
 0x24e   :  { %v217_v44 = vpack.c.bf16 %v2777_v43, %v2777_v43 }
 0x250   :  { %225 = vrot.lane.b32.xlu1 %v217_v44, %s2610_s17 }
 0x254   :  { %351 = vrot.lane.b32.xlu1 %v349_v50, %s2609_s23 }
 0x2c2   :  { %v226_v51 = vpop.permute.xlu1 %225 }
 0x2c3   :  { %2249 = vmatmul.mubr.msk.bf16.vlgmr.msra.gmra.mrb[4].mxu0 %vm82_vm1, %v226_v51  ;;  %2273 = vmatmul.mubr.msk.bf16.vlgmr.msra.gmra.mrb[8].mxu1 %vm82_vm1, %v226_v51 }
 0x2c4   :  { %2261 = vmatpush3.bf16.msra.mxu0 %v2671_v1  ;;  %2264 = vmatprep.mubr.msk.bf16.mxu0 %vm2607_vm0, %v2606_v0 }
 0x2c5   :  { %2262 = vmatprep.subr.bf16.mxu0 %v2606_v0  ;;  %2285 = vmatpush3.bf16.msra.mxu1 %v2736_v31 }
 0x2c6   :  { %2286 = vmatprep.subr.bf16.mxu1 %v2606_v0  ;;  %2288 = vmatprep.mubr.msk.bf16.mxu1 %vm2607_vm0, %v2606_v0  ;;  %v352_v15 = vpop.permute.xlu1 %351 }
 0x2c8   :  { %2263 = vmatpush3.bf16.msra.mxu0 %v2686_v3 }
 0x2c9   :  { %2287 = vmatpush3.bf16.msra.mxu1 %v2741_v32  ;;  %2276 = vmatprep.subr.bf16.mxu0 %v2606_v0 }
 0x2ca   :  { %2300 = vmatprep.subr.bf16.mxu1 %v2606_v0 }
 0x2cb   :  { %2265 = vmatmul.mubr.msk.bf16.vlgmr.msra.gmra.mrb[8].mxu0 %vm82_vm1, %v2083_v52 }
 0x2cc   :  { %2277 = vmatpush3.bf16.msra.mxu0 %v2747_v33  ;;  %2280 = vmatprep.mubr.msk.bf16.mxu0 %vm2607_vm0, %v2606_v0 }
 0x2cd   :  { %2278 = vmatprep.subr.bf16.mxu0 %v2606_v0 }
 0x2d0   :  { %2279 = vmatpush3.bf16.msra.mxu0 %v2754_v35 }
 0x2d1   :  { %2292 = vmatprep.subr.bf16.mxu0 %v2606_v0 }
 0x396   :  { %v276_v54 = vpop.f32.mrb[4].mxu0  ;;  %v455_v55 = vpop.f32.mrb[8].mxu1 }
 0x397   :  { %v277_v56 = vadd.f32 %v2814_v53, %v276_v54  ;;  %v468_v57 = vadd.f32 %v455_v55, %v2715_v8  ;;  %v2250_v58 = vpop.f32.mrb[5].mxu0  ;;  %v2274_v59 = vpop.f32.mrb[9].mxu1 }
 0x398   :  { %v279_v60 = vpop.f32.mrb[6].mxu0  ;;  %v458_v61 = vpop.f32.mrb[10].mxu1  ;;  %v2090_v58 = vld [vmem:[%s3285_s1 + $0x4] sm:$0x3] }
 0x399   :  { %v334_v62 = vadd.f32 %v328_v45, %v277_v56  ;;  %470 = vrot.lane.b32.xlu0 %v468_v57, %s2609_s23  ;;  %v2251_v63 = vpop.f32.mrb[7].mxu0  ;;  %v2275_v6 = vpop.f32.mrb[11].mxu1 }
 0x39b   :  { %v2081_v7 = vmul.f32 -1.442695, %v334_v62 }
 0x39d   :  { %2505 = vpow2.f32 %v2081_v7 }
 0x39e   :  { %v415_v9 = vpop.f32.mrb[8].mxu0 }
 0x39f   :  { %v2266_v10 = vpop.f32.mrb[9].mxu0  ;;  %v416_v19 = vadd.f32 %v2722_v18, %v415_v9 }
 0x3a0   :  { %v418_v11 = vpop.f32.mrb[10].mxu0 }
 0x3a1   :  { %v2267_v12 = vpop.f32.mrb[11].mxu0  ;;  %v461_v20 = vadd.f32 %v455_v55, %v416_v19 }
 0x3a3   :  { %v2086_v21 = vmul.f32 -1.442695, %v461_v20 }
 0x3a7   :  { %v2506_v13 = vpop.eup %2505 }
 0x3a8   :  { %v338_v14 = vadd.f32 1.0, %v2506_v13 }
 0x3aa   :  { %2507 = vrcp.f32 %v338_v14 }
 0x3ab   :  { %2509 = vpow2.f32 %v2086_v21 }
 0x3b4   :  { %v2508_v16 = vpop.eup %2507 }
 0x3b5   :  { %v354_v17 = vmul.f32 %v2508_v16, %v352_v15  ;;  %v2510_v22 = vpop.eup %2509  ;;  %v361_v40 = vsub.f32 1.0, %v2508_v16  ;;  %v367_v42 = vmul.f32 0.0, %v2508_v16 }
 0x3b6   :  { %v465_v23 = vadd.f32 1.0, %v2510_v22 }
 0x3b7   :  { %356 = vrot.lane.b32.xlu1 %v354_v17, %s2609_s23 }
 0x3b8   :  { %2511 = vrcp.f32 %v465_v23 }
 0x3c2   :  { %v2512_v25 = vpop.eup %2511 }
 0x3c3   :  { %v480_v48 = vsub.f32 1.0, %v2512_v25  ;;  %v486_v52 = vmul.f32 %v2512_v25, %v2777_v43 }
 0x40b   :  { %v471_v26 = vpop.permute.xlu0 %470 }
 0x40c   :  { %v473_v27 = vmul.f32 %v2512_v25, %v471_v26 }
 0x40e   :  { %475 = vrot.lane.b32.xlu0 %v473_v27, %s2609_s23 }
 0x412   :  { %375 = vperm.xlu0 %2490, %v373_v28  }
 0x429   :  { %v357_v29 = vpop.permute.xlu1 %356 }
 0x42a   :  { %v359_v30 = vadd.f32 %v357_v29, %v277_v56 }
 0x42c   :  { %2513 = vtanh.f32 %v359_v30 }
 0x436   :  { %v2514_v34 = vpop.eup %2513 }
 0x437   :  { %363 = vrot.lane.b32.xlu1 %v2514_v34, %s2610_s17 }
 0x480   :  { %v476_v36 = vpop.permute.xlu0 %475 }
 0x481   :  { %v478_v38 = vadd.f32 %v476_v36, %v416_v19 }
 0x483   :  { %2515 = vtanh.f32 %v478_v38 }
 0x48d   :  { %v2516_v39 = vpop.eup %2515 }
 0x48e   :  { %482 = vrot.lane.b32.xlu1 %v2516_v39, %s2610_s17 }
 0x491   :  { %v2833_v50 = vpop.permute.xlu0 %375 }
 0x492   :  { %vm377_vm5 = vcmp.eq.s32.totalorder %v2833_v50, 1 }
 0x4a9   :  { %v364_v41 = vpop.permute.xlu1 %363 }
 0x4aa   :  { %v366_v44 = vmul.f32 %v364_v41, %v361_v40 }
 0x4ac   :  { %v368_v45 = vadd.f32 %v367_v42, %v366_v44  ;;  %v614_v44 = vsel %vm613_vm6, 1, %v2608_v4 }
 0x4ae   :  { %v2828_v46 = vsel %vm63_vm3, %v368_v45, 0.0 }
 0x4af   :  { %v536_v47 = vpack.c.bf16 %v2828_v46, %v2828_v46 }
 0x4b1   :  { %538 = vrot.lane.b32.xlu1 %v536_v47, %s2610_s17 }
 0x500   :  { %v483_v51 = vpop.permute.xlu1 %482 }
 0x501   :  { %v485_v54 = vmul.f32 %v483_v51, %v480_v48 }
 0x503   :  { %v487_v55 = vadd.f32 %v486_v52, %v485_v54 }
 0x505   :  { %v2840_v37 = vsel %vm377_vm5, %v487_v55, %v2777_v43 }
 0x506   :  { %v489_v56 = vpack.c.bf16 %v2840_v37, %v2840_v37 }
 0x508   :  { %491 = vrot.lane.b32.xlu0 %v489_v56, %s2610_s17 }
 0x523   :  { %v539_v57 = vpop.permute.xlu1 %538 }
 0x524   :  { %2289 = vmatmul.mubr.msk.bf16.vlgmr.msra.gmra.mrb[12].mxu1 %vm82_vm1, %v539_v57 }
 0x525   :  { %2301 = vmatpush3.bf16.msra.mxu1 %v2676_v2  ;;  %2304 = vmatprep.mubr.msk.bf16.mxu1 %vm2607_vm0, %v2606_v0 }
 0x526   :  { %2302 = vmatprep.subr.bf16.mxu1 %v2606_v0 }
 0x529   :  { %2303 = vmatpush3.bf16.msra.mxu1 %v2694_v5 }
 0x52a   :  { %2316 = vmatprep.subr.bf16.mxu1 %v2606_v0 }
 0x57a   :  { %v492_v43 = vpop.permute.xlu0 %491 }
 0x57b   :  { %2281 = vmatmul.mubr.msk.bf16.vlgmr.msra.gmra.mrb[12].mxu0 %vm82_vm1, %v492_v43  ;;  %2305 = vmatmul.mubr.msk.bf16.vlgmr.msra.gmra.mrb[16].mxu1 %vm82_vm1, %v492_v43 }
 0x57c   :  { %2293 = vmatpush3.bf16.msra.mxu0 %v2671_v1  ;;  %2296 = vmatprep.mubr.msk.bf16.mxu0 %vm2607_vm0, %v2606_v0 }
 0x57d   :  { %2294 = vmatprep.subr.bf16.mxu0 %v2606_v0  ;;  %2317 = vmatpush3.bf16.msra.mxu1 %v2736_v31 }
 0x57e   :  { %2318 = vmatprep.subr.bf16.mxu1 %v2606_v0  ;;  %2320 = vmatprep.mubr.msk.bf16.mxu1 %vm2607_vm0, %v2606_v0 }
 0x580   :  { %2295 = vmatpush3.bf16.msra.mxu0 %v2686_v3 }
 0x581   :  { %2319 = vmatpush3.bf16.msra.mxu1 %v2741_v32  ;;  %2308 = vmatprep.subr.bf16.mxu0 %v2606_v0 }
 0x582   :  { %2332 = vmatprep.subr.bf16.mxu1 %v2606_v0 }
 0x583   :  { %2297 = vmatmul.mubr.msk.bf16.vlgmr.msra.gmra.mrb[16].mxu0 %vm82_vm1, %v2090_v58 }
 0x584   :  { %2309 = vmatpush3.bf16.msra.mxu0 %v2747_v33  ;;  %2312 = vmatprep.mubr.msk.bf16.mxu0 %vm2607_vm0, %v2606_v0 }
 0x585   :  { %2310 = vmatprep.subr.bf16.mxu0 %v2606_v0 }
 0x588   :  { %2311 = vmatpush3.bf16.msra.mxu0 %v2754_v35 }
 0x589   :  { %2324 = vmatprep.subr.bf16.mxu0 %v2606_v0 }
 0x5f7   :  { %v577_v59 = vpop.f32.mrb[12].mxu1 }
 0x5f8   :  { %v590_v60 = vadd.f32 %v577_v59, %v2783_v49  ;;  %v2290_v61 = vpop.f32.mrb[13].mxu1 }
 0x5f9   :  { %v580_v62 = vpop.f32.mrb[14].mxu1 }
 0x5fa   :  { %592 = vrot.lane.b32.xlu1 %v590_v60, %s2609_s23  ;;  %v2291_v63 = vpop.f32.mrb[15].mxu1 }
 0x64e   :  { %v530_v6 = vpop.f32.mrb[12].mxu0  ;;  %v696_v7 = vpop.f32.mrb[16].mxu1 }
 0x64f   :  { %v531_v9 = vadd.f32 %v2814_v53, %v530_v6  ;;  %v709_v10 = vadd.f32 %v696_v7, %v2715_v8  ;;  %v2282_v11 = vpop.f32.mrb[13].mxu0  ;;  %v2306_v12 = vpop.f32.mrb[17].mxu1 }
 0x650   :  { %v533_v13 = vpop.f32.mrb[14].mxu0  ;;  %v699_v14 = vpop.f32.mrb[18].mxu1  ;;  %v2097_v11 = vld [vmem:[%s3285_s1 + $0x6] sm:$0x3] }
 0x651   :  { %v583_v15 = vadd.f32 %v577_v59, %v531_v9  ;;  %v2283_v16 = vpop.f32.mrb[15].mxu0  ;;  %711 = vrot.lane.b32.xlu0 %v709_v10, %s2609_s23  ;;  %v2307_v17 = vpop.f32.mrb[19].mxu1 }
 0x653   :  { %v2089_v19 = vmul.f32 -1.442695, %v583_v15 }
 0x655   :  { %2517 = vpow2.f32 %v2089_v19 }
 0x656   :  { %v656_v20 = vpop.f32.mrb[16].mxu0 }
 0x657   :  { %v2298_v21 = vpop.f32.mrb[17].mxu0  ;;  %v657_v30 = vadd.f32 %v2722_v18, %v656_v20 }
 0x658   :  { %v659_v22 = vpop.f32.mrb[18].mxu0 }
 0x659   :  { %v2299_v23 = vpop.f32.mrb[19].mxu0  ;;  %v702_v34 = vadd.f32 %v696_v7, %v657_v30 }
 0x65b   :  { %v2093_v36 = vmul.f32 -1.442695, %v702_v34 }
 0x65f   :  { %v2518_v25 = vpop.eup %2517 }
 0x660   :  { %v587_v26 = vadd.f32 1.0, %v2518_v25 }
 0x662   :  { %2519 = vrcp.f32 %v587_v26 }
 0x663   :  { %2521 = vpow2.f32 %v2093_v36 }
 0x66c   :  { %v2520_v27 = vpop.eup %2519  ;;  %v593_v28 = vpop.permute.xlu1 %592 }
 0x66d   :  { %v595_v29 = vmul.f32 %v2520_v27, %v593_v28  ;;  %v2522_v38 = vpop.eup %2521  ;;  %v602_v55 = vsub.f32 1.0, %v2520_v27  ;;  %v608_v57 = vmul.f32 %v2520_v27, %v2828_v46 }
 0x66e   :  { %v706_v39 = vadd.f32 1.0, %v2522_v38 }
 0x66f   :  { %597 = vrot.lane.b32.xlu1 %v595_v29, %s2609_s23 }
 0x670   :  { %2523 = vrcp.f32 %v706_v39 }
 0x67a   :  { %v2524_v40 = vpop.eup %2523 }
 0x67b   :  { %v721_v61 = vsub.f32 1.0, %v2524_v40  ;;  %v727_v6 = vmul.f32 %v2524_v40, %v2840_v37 }
 0x6c3   :  { %v712_v41 = vpop.permute.xlu0 %711 }
 0x6c4   :  { %v714_v42 = vmul.f32 %v2524_v40, %v712_v41 }
 0x6c6   :  { %716 = vrot.lane.b32.xlu0 %v714_v42, %s2609_s23 }
 0x6ca   :  { %616 = vperm.xlu0 %2490, %v614_v44  }
 0x6e1   :  { %v598_v45 = vpop.permute.xlu1 %597 }
 0x6e2   :  { %v600_v47 = vadd.f32 %v598_v45, %v531_v9 }
 0x6e4   :  { %2525 = vtanh.f32 %v600_v47 }
 0x6ee   :  { %v2526_v48 = vpop.eup %2525 }
 0x6ef   :  { %604 = vrot.lane.b32.xlu1 %v2526_v48, %s2610_s17 }
 0x738   :  { %v717_v51 = vpop.permute.xlu0 %716 }
 0x739   :  { %v719_v52 = vadd.f32 %v717_v51, %v657_v30 }
 0x73b   :  { %2527 = vtanh.f32 %v719_v52 }
 0x745   :  { %v2528_v54 = vpop.eup %2527 }
 0x746   :  { %723 = vrot.lane.b32.xlu1 %v2528_v54, %s2610_s17 }
 0x749   :  { %v2897_v63 = vpop.permute.xlu0 %616 }
 0x74a   :  { %vm618_vm7 = vcmp.eq.s32.totalorder %v2897_v63, 1 }
 0x761   :  { %v605_v56 = vpop.permute.xlu1 %604 }
 0x762   :  { %v607_v43 = vmul.f32 %v605_v56, %v602_v55 }
 0x764   :  { %v609_v58 = vadd.f32 %v608_v57, %v607_v43  ;;  %v855_v43 = vsel %vm854_vm8, 1, %v2608_v4 }
 0x766   :  { %v2892_v59 = vsel %vm377_vm5, %v609_v58, %v2828_v46 }
 0x767   :  { %v777_v60 = vpack.c.bf16 %v2892_v59, %v2892_v59 }
 0x769   :  { %779 = vrot.lane.b32.xlu0 %v777_v60, %s2610_s17 }
 0x7b8   :  { %v724_v62 = vpop.permute.xlu1 %723 }
 0x7b9   :  { %v726_v7 = vmul.f32 %v724_v62, %v721_v61 }
 0x7bb   :  { %v728_v9 = vadd.f32 %v727_v6, %v726_v7 }
 0x7bd   :  { %v2904_v46 = vsel %vm618_vm7, %v728_v9, %v2840_v37 }
 0x7be   :  { %v730_v50 = vpack.c.bf16 %v2904_v46, %v2904_v46 }
 0x7c0   :  { %732 = vrot.lane.b32.xlu1 %v730_v50, %s2610_s17 }
 0x7db   :  { %v780_v10 = vpop.permute.xlu0 %779 }
 0x7dc   :  { %2321 = vmatmul.mubr.msk.bf16.vlgmr.msra.gmra.mrb[20].mxu1 %vm82_vm1, %v780_v10 }
 0x7dd   :  { %2333 = vmatpush3.bf16.msra.mxu1 %v2676_v2  ;;  %2336 = vmatprep.mubr.msk.bf16.mxu1 %vm2607_vm0, %v2606_v0 }
 0x7de   :  { %2334 = vmatprep.subr.bf16.mxu1 %v2606_v0 }
 0x7e1   :  { %2335 = vmatpush3.bf16.msra.mxu1 %v2694_v5 }
 0x7e2   :  { %2348 = vmatprep.subr.bf16.mxu1 %v2606_v0 }
 0x832   :  { %v733_v37 = vpop.permute.xlu1 %732 }
 0x833   :  { %2313 = vmatmul.mubr.msk.bf16.vlgmr.msra.gmra.mrb[20].mxu0 %vm82_vm1, %v733_v37  ;;  %2337 = vmatmul.mubr.msk.bf16.vlgmr.msra.gmra.mrb[24].mxu1 %vm82_vm1, %v733_v37 }
 0x834   :  { %2325 = vmatpush3.bf16.msra.mxu0 %v2671_v1  ;;  %2328 = vmatprep.mubr.msk.bf16.mxu0 %vm2607_vm0, %v2606_v0 }
 0x835   :  { %2326 = vmatprep.subr.bf16.mxu0 %v2606_v0  ;;  %2349 = vmatpush3.bf16.msra.mxu1 %v2736_v31 }
 0x836   :  { %2350 = vmatprep.subr.bf16.mxu1 %v2606_v0  ;;  %2352 = vmatprep.mubr.msk.bf16.mxu1 %vm2607_vm0, %v2606_v0 }
 0x838   :  { %2327 = vmatpush3.bf16.msra.mxu0 %v2686_v3 }
 0x839   :  { %2351 = vmatpush3.bf16.msra.mxu1 %v2741_v32  ;;  %2340 = vmatprep.subr.bf16.mxu0 %v2606_v0 }
 0x83a   :  { %2364 = vmatprep.subr.bf16.mxu1 %v2606_v0 }
 0x83b   :  { %2329 = vmatmul.mubr.msk.bf16.vlgmr.msra.gmra.mrb[24].mxu0 %vm82_vm1, %v2097_v11 }
 0x83c   :  { %2341 = vmatpush3.bf16.msra.mxu0 %v2747_v33  ;;  %2344 = vmatprep.mubr.msk.bf16.mxu0 %vm2607_vm0, %v2606_v0 }
 0x83d   :  { %2342 = vmatprep.subr.bf16.mxu0 %v2606_v0 }
 0x840   :  { %2343 = vmatpush3.bf16.msra.mxu0 %v2754_v35 }
 0x841   :  { %2356 = vmatprep.subr.bf16.mxu0 %v2606_v0 }
 0x8af   :  { %v818_v12 = vpop.f32.mrb[20].mxu1 }
 0x8b0   :  { %v831_v13 = vadd.f32 %v818_v12, %v2783_v49  ;;  %v2322_v14 = vpop.f32.mrb[21].mxu1 }
 0x8b1   :  { %v821_v15 = vpop.f32.mrb[22].mxu1 }
 0x8b2   :  { %833 = vrot.lane.b32.xlu0 %v831_v13, %s2609_s23  ;;  %v2323_v16 = vpop.f32.mrb[23].mxu1 }
 0x906   :  { %v771_v17 = vpop.f32.mrb[20].mxu0  ;;  %v937_v19 = vpop.f32.mrb[24].mxu1 }
 0x907   :  { %v772_v20 = vadd.f32 %v2814_v53, %v771_v17  ;;  %v950_v21 = vadd.f32 %v937_v19, %v2715_v8  ;;  %v2314_v22 = vpop.f32.mrb[21].mxu0  ;;  %v2338_v23 = vpop.f32.mrb[25].mxu1 }
 0x908   :  { %v774_v25 = vpop.f32.mrb[22].mxu0  ;;  %v940_v26 = vpop.f32.mrb[26].mxu1  ;;  %v2104_v22 = vld [vmem:[%s3285_s1 + $0x8] sm:$0x3] }
 0x909   :  { %v824_v27 = vadd.f32 %v818_v12, %v772_v20  ;;  %v2315_v28 = vpop.f32.mrb[23].mxu0  ;;  %952 = vrot.lane.b32.xlu1 %v950_v21, %s2609_s23  ;;  %v2339_v29 = vpop.f32.mrb[27].mxu1 }
 0x90b   :  { %v2096_v30 = vmul.f32 -1.442695, %v824_v27 }
 0x90d   :  { %2529 = vpow2.f32 %v2096_v30 }
 0x90e   :  { %v897_v34 = vpop.f32.mrb[24].mxu0 }
 0x90f   :  { %v2330_v36 = vpop.f32.mrb[25].mxu0  ;;  %v898_v47 = vadd.f32 %v2722_v18, %v897_v34 }
 0x910   :  { %v900_v38 = vpop.f32.mrb[26].mxu0 }
 0x911   :  { %v2331_v39 = vpop.f32.mrb[27].mxu0  ;;  %v943_v48 = vadd.f32 %v937_v19, %v898_v47 }
 0x913   :  { %v2100_v51 = vmul.f32 -1.442695, %v943_v48 }
 0x917   :  { %v2530_v40 = vpop.eup %2529 }
 0x918   :  { %v828_v41 = vadd.f32 1.0, %v2530_v40 }
 0x91a   :  { %2531 = vrcp.f32 %v828_v41 }
 0x91b   :  { %2533 = vpow2.f32 %v2100_v51 }
 0x924   :  { %v2532_v42 = vpop.eup %2531  ;;  %v834_v44 = vpop.permute.xlu0 %833 }
 0x925   :  { %v836_v45 = vmul.f32 %v2532_v42, %v834_v44  ;;  %v2534_v52 = vpop.eup %2533  ;;  %v843_v9 = vsub.f32 1.0, %v2532_v42  ;;  %v849_v10 = vmul.f32 %v2532_v42, %v2892_v59 }
 0x926   :  { %v947_v54 = vadd.f32 1.0, %v2534_v52 }
 0x927   :  { %838 = vrot.lane.b32.xlu0 %v836_v45, %s2609_s23 }
 0x928   :  { %2535 = vrcp.f32 %v947_v54 }
 0x932   :  { %v2536_v55 = vpop.eup %2535 }
 0x933   :  { %v962_v14 = vsub.f32 1.0, %v2536_v55  ;;  %v968_v17 = vmul.f32 %v2536_v55, %v2904_v46 }
 0x97b   :  { %v953_v56 = vpop.permute.xlu1 %952 }
 0x97c   :  { %v955_v57 = vmul.f32 %v2536_v55, %v953_v56 }
 0x97e   :  { %957 = vrot.lane.b32.xlu1 %v955_v57, %s2609_s23 }
 0x982   :  { %857 = vperm.xlu1 %2489, %v855_v43  }
 0x999   :  { %v839_v58 = vpop.permute.xlu0 %838 }
 0x99a   :  { %v841_v60 = vadd.f32 %v839_v58, %v772_v20 }
 0x99c   :  { %2537 = vtanh.f32 %v841_v60 }
 0x9a6   :  { %v2538_v61 = vpop.eup %2537 }
 0x9a7   :  { %845 = vrot.lane.b32.xlu0 %v2538_v61, %s2610_s17 }
 0x9f0   :  { %v958_v62 = vpop.permute.xlu1 %957 }
 0x9f1   :  { %v960_v6 = vadd.f32 %v958_v62, %v898_v47 }
 0x9f3   :  { %2539 = vtanh.f32 %v960_v6 }
 0x9fd   :  { %v2540_v7 = vpop.eup %2539 }
 0x9fe   :  { %964 = vrot.lane.b32.xlu0 %v2540_v7, %s2610_s17 }
 0xa01   :  { %v2961_v16 = vpop.permute.xlu1 %857 }
 0xa02   :  { %vm859_vm9 = vcmp.eq.s32.totalorder %v2961_v16, 1 }
 0xa19   :  { %v846_v50 = vpop.permute.xlu0 %845 }
 0xa1a   :  { %v848_v37 = vmul.f32 %v846_v50, %v843_v9 }
 0xa1c   :  { %v850_v11 = vadd.f32 %v849_v10, %v848_v37  ;;  %v1096_v10 = vsel %vm1095_vm10, 1, %v2608_v4 }
 0xa1e   :  { %v2956_v12 = vsel %vm618_vm7, %v850_v11, %v2892_v59 }
 0xa1f   :  { %v1018_v13 = vpack.c.bf16 %v2956_v12, %v2956_v12 }
 0xa21   :  { %1020 = vrot.lane.b32.xlu1 %v1018_v13, %s2610_s17 }
 0xa70   :  { %v965_v15 = vpop.permute.xlu0 %964 }
 0xa71   :  { %v967_v19 = vmul.f32 %v965_v15, %v962_v14 }
 0xa73   :  { %v969_v20 = vadd.f32 %v968_v17, %v967_v19 }
 0xa75   :  { %v2968_v59 = vsel %vm859_vm9, %v969_v20, %v2904_v46 }
 0xa76   :  { %v971_v63 = vpack.c.bf16 %v2968_v59, %v2968_v59 }
 0xa78   :  { %973 = vrot.lane.b32.xlu0 %v971_v63, %s2610_s17 }
 0xa93   :  { %v1021_v21 = vpop.permute.xlu1 %1020 }
 0xa94   :  { %2353 = vmatmul.mubr.msk.bf16.vlgmr.msra.gmra.mrb[28].mxu1 %vm82_vm1, %v1021_v21 }
 0xa95   :  { %2365 = vmatpush3.bf16.msra.mxu1 %v2676_v2  ;;  %2368 = vmatprep.mubr.msk.bf16.mxu1 %vm2607_vm0, %v2606_v0 }
 0xa96   :  { %2366 = vmatprep.subr.bf16.mxu1 %v2606_v0 }
 0xa99   :  { %2367 = vmatpush3.bf16.msra.mxu1 %v2694_v5 }
 0xa9a   :  { %2380 = vmatprep.subr.bf16.mxu1 %v2606_v0 }
 0xaea   :  { %v974_v46 = vpop.permute.xlu0 %973 }
 0xaeb   :  { %2345 = vmatmul.mubr.msk.bf16.vlgmr.msra.gmra.mrb[28].mxu0 %vm82_vm1, %v974_v46  ;;  %2369 = vmatmul.mubr.msk.bf16.vlgmr.msra.gmra.mrb[32].mxu1 %vm82_vm1, %v974_v46 }
 0xaec   :  { %2357 = vmatpush3.bf16.msra.mxu0 %v2671_v1  ;;  %2360 = vmatprep.mubr.msk.bf16.mxu0 %vm2607_vm0, %v2606_v0 }
 0xaed   :  { %2358 = vmatprep.subr.bf16.mxu0 %v2606_v0  ;;  %2381 = vmatpush3.bf16.msra.mxu1 %v2736_v31 }
 0xaee   :  { %2382 = vmatprep.subr.bf16.mxu1 %v2606_v0  ;;  %2384 = vmatprep.mubr.msk.bf16.mxu1 %vm2607_vm0, %v2606_v0 }
 0xaf0   :  { %2359 = vmatpush3.bf16.msra.mxu0 %v2686_v3 }
 0xaf1   :  { %2383 = vmatpush3.bf16.msra.mxu1 %v2741_v32  ;;  %2372 = vmatprep.subr.bf16.mxu0 %v2606_v0 }
 0xaf2   :  { %2396 = vmatprep.subr.bf16.mxu1 %v2606_v0 }
 0xaf3   :  { %2361 = vmatmul.mubr.msk.bf16.vlgmr.msra.gmra.mrb[32].mxu0 %vm82_vm1, %v2104_v22 }
 0xaf4   :  { %2373 = vmatpush3.bf16.msra.mxu0 %v2747_v33  ;;  %2376 = vmatprep.mubr.msk.bf16.mxu0 %vm2607_vm0, %v2606_v0 }
 0xaf5   :  { %2374 = vmatprep.subr.bf16.mxu0 %v2606_v0 }
 0xaf8   :  { %2375 = vmatpush3.bf16.msra.mxu0 %v2754_v35 }
 0xaf9   :  { %2388 = vmatprep.subr.bf16.mxu0 %v2606_v0 }
 0xb67   :  { %v1059_v1 = vpop.f32.mrb[28].mxu1 }
 0xb68   :  { %v1072_v23 = vadd.f32 %v1059_v1, %v2783_v49  ;;  %v2354_v25 = vpop.f32.mrb[29].mxu1 }
 0xb69   :  { %v1062_v26 = vpop.f32.mrb[30].mxu1 }
 0xb6a   :  { %1074 = vrot.lane.b32.xlu1 %v1072_v23, %s2609_s23  ;;  %v2355_v27 = vpop.f32.mrb[31].mxu1 }
 0xbbe   :  { %v1012_v28 = vpop.f32.mrb[28].mxu0  ;;  %v1178_v29 = vpop.f32.mrb[32].mxu1 }
 0xbbf   :  { %v1013_v30 = vadd.f32 %v2814_v53, %v1012_v28  ;;  %v1191_v34 = vadd.f32 %v1178_v29, %v2715_v8  ;;  %v2346_v36 = vpop.f32.mrb[29].mxu0  ;;  %v2370_v38 = vpop.f32.mrb[33].mxu1 }
 0xbc0   :  { %v1015_v39 = vpop.f32.mrb[30].mxu0  ;;  %v1181_v40 = vpop.f32.mrb[34].mxu1 }
 0xbc1   :  { %v1065_v41 = vadd.f32 %v1059_v1, %v1013_v30  ;;  %v2347_v42 = vpop.f32.mrb[31].mxu0  ;;  %1193 = vrot.lane.b32.xlu0 %v1191_v34, %s2609_s23  ;;  %v2371_v44 = vpop.f32.mrb[35].mxu1 }
 0xbc3   :  { %v2103_v45 = vmul.f32 -1.442695, %v1065_v41 }
 0xbc5   :  { %2541 = vpow2.f32 %v2103_v45 }
 0xbc6   :  { %v1138_v47 = vpop.f32.mrb[32].mxu0 }
 0xbc7   :  { %v2362_v48 = vpop.f32.mrb[33].mxu0  ;;  %v1139_v58 = vadd.f32 %v2722_v18, %v1138_v47 }
 0xbc8   :  { %v1141_v51 = vpop.f32.mrb[34].mxu0 }
 0xbc9   :  { %v2363_v52 = vpop.f32.mrb[35].mxu0  ;;  %v1184_v60 = vadd.f32 %v1178_v29, %v1139_v58  ;;  %v3049_v29 = vld [vmem:[%s3282_s2] sm:$0xff]  }
 0xbcb   :  { %v2107_v61 = vmul.f32 -1.442695, %v1184_v60  ;;  %v3082_v60 = vld [vmem:[%s3286_s4] ss:$0 sm:$0xff] }
 0xbcf   :  { %v2542_v54 = vpop.eup %2541 }
 0xbd0   :  { %v1069_v55 = vadd.f32 1.0, %v2542_v54 }
 0xbd2   :  { %2543 = vrcp.f32 %v1069_v55 }
 0xbd3   :  { %2545 = vpow2.f32 %v2107_v61 }
 0xbdc   :  { %v2544_v56 = vpop.eup %2543  ;;  %v1075_v57 = vpop.permute.xlu1 %1074 }
 0xbdd   :  { %v1077_v43 = vmul.f32 %v2544_v56, %v1075_v57  ;;  %v2546_v62 = vpop.eup %2545  ;;  %v1084_v17 = vsub.f32 1.0, %v2544_v56  ;;  %v1090_v24 = vmul.f32 %v2544_v56, %v2956_v12 }
 0xbde   :  { %v1188_v6 = vadd.f32 1.0, %v2546_v62 }
 0xbdf   :  { %1079 = vrot.lane.b32.xlu1 %v1077_v43, %s2609_s23 }
 0xbe0   :  { %2547 = vrcp.f32 %v1188_v6 }
 0xbea   :  { %v2548_v7 = vpop.eup %2547 }
 0xbeb   :  { %v1203_v22 = vsub.f32 1.0, %v2548_v7  ;;  %v1209_v25 = vmul.f32 %v2548_v7, %v2968_v59 }
 0xc33   :  { %v1194_v9 = vpop.permute.xlu0 %1193 }
 0xc34   :  { %v1196_v50 = vmul.f32 %v2548_v7, %v1194_v9 }
 0xc36   :  { %1198 = vrot.lane.b32.xlu0 %v1196_v50, %s2609_s23 }
 0xc3a   :  { %1098 = vperm.xlu0 %2490, %v1096_v10  }
 0xc51   :  { %v1080_v37 = vpop.permute.xlu1 %1079 }
 0xc52   :  { %v1082_v11 = vadd.f32 %v1080_v37, %v1013_v30 }
 0xc54   :  { %2549 = vtanh.f32 %v1082_v11  ;;  %v3088_v11 = vld [vmem:[%s3287_s0] sm:$0xf] }
 0xc55   :  { %vm1336_vm12 = vcmp.gt.s32.totalorder %v3088_v11, 5  ;;  %vm1577_vm14 = vcmp.gt.s32.totalorder %v3088_v11, 6 }
 0xc5e   :  { %v2550_v18 = vpop.eup %2549 }
 0xc5f   :  { %1086 = vrot.lane.b32.xlu1 %v2550_v18, %s2610_s17  ;;  %v1337_v18 = vsel %vm1336_vm12, 1, %v2608_v4 }
 0xca8   :  { %v1199_v13 = vpop.permute.xlu0 %1198 }
 0xca9   :  { %v1201_v14 = vadd.f32 %v1199_v13, %v1139_v58 }
 0xcab   :  { %2551 = vtanh.f32 %v1201_v14 }
 0xcb5   :  { %v2552_v15 = vpop.eup %2551 }
 0xcb6   :  { %1205 = vrot.lane.b32.xlu1 %v2552_v15, %s2610_s17 }
 0xcb9   :  { %v3025_v23 = vpop.permute.xlu0 %1098 }
 0xcba   :  { %vm1100_vm11 = vcmp.eq.s32.totalorder %v3025_v23, 1 }
 0xcd1   :  { %v1087_v19 = vpop.permute.xlu1 %1086 }
 0xcd2   :  { %v1089_v20 = vmul.f32 %v1087_v19, %v1084_v17 }
 0xcd4   :  { %v1091_v63 = vadd.f32 %v1090_v24, %v1089_v20 }
 0xcd6   :  { %v3020_v21 = vsel %vm859_vm9, %v1091_v63, %v2956_v12 }
 0xcd7   :  { %v1259_v46 = vpack.c.bf16 %v3020_v21, %v3020_v21 }
 0xcd9   :  { %1261 = vrot.lane.b32.xlu0 %v1259_v46, %s2610_s17 }
 0xd28   :  { %v1206_v1 = vpop.permute.xlu1 %1205 }
 0xd29   :  { %v1208_v26 = vmul.f32 %v1206_v1, %v1203_v22 }
 0xd2b   :  { %v1210_v27 = vadd.f32 %v1209_v25, %v1208_v26 }
 0xd2d   :  { %v3032_v12 = vsel %vm1100_vm11, %v1210_v27, %v2968_v59 }
 0xd2e   :  { %v1212_v16 = vpack.c.bf16 %v3032_v12, %v3032_v12 }
 0xd30   :  { %1214 = vrot.lane.b32.xlu1 %v1212_v16, %s2610_s17 }
 0xd4b   :  { %v1262_v28 = vpop.permute.xlu0 %1261 }
 0xd4c   :  { %2385 = vmatmul.mubr.msk.bf16.vlgmr.msra.gmra.mrb[36].mxu1 %vm82_vm1, %v1262_v28 }
 0xd4d   :  { %2397 = vmatpush3.bf16.msra.mxu1 %v2676_v2  ;;  %2400 = vmatprep.mubr.msk.bf16.mxu1 %vm2607_vm0, %v2606_v0  ;;  %v2111_v2 = vld [vmem:[%s3285_s1 + $0xa] sm:$0x3] }
 0xd4e   :  { %2398 = vmatprep.subr.bf16.mxu1 %v2606_v0 }
 0xd51   :  { %2399 = vmatpush3.bf16.msra.mxu1 %v2694_v5 }
 0xd52   :  { %2412 = vmatprep.subr.bf16.mxu1 %v2606_v0 }
 0xda2   :  { %v1215_v59 = vpop.permute.xlu1 %1214 }
 0xda3   :  { %2377 = vmatmul.mubr.msk.bf16.vlgmr.msra.gmra.mrb[36].mxu0 %vm82_vm1, %v1215_v59  ;;  %2401 = vmatmul.mubr.msk.bf16.vlgmr.msra.gmra.mrb[40].mxu1 %vm82_vm1, %v1215_v59 }
 0xda4   :  { %2389 = vmatpush3.bf16.msra.mxu0 %v3049_v29  ;;  %2392 = vmatprep.mubr.msk.bf16.mxu0 %vm2607_vm0, %v2606_v0 }
 0xda5   :  { %2390 = vmatprep.subr.bf16.mxu0 %v2606_v0  ;;  %2413 = vmatpush3.bf16.msra.mxu1 %v2736_v31 }
 0xda6   :  { %2414 = vmatprep.subr.bf16.mxu1 %v2606_v0  ;;  %2416 = vmatprep.mubr.msk.bf16.mxu1 %vm2607_vm0, %v2606_v0 }
 0xda8   :  { %2391 = vmatpush3.bf16.msra.mxu0 %v2686_v3 }
 0xda9   :  { %2415 = vmatpush3.bf16.msra.mxu1 %v2741_v32  ;;  %2404 = vmatprep.subr.bf16.mxu0 %v2606_v0 }
 0xdaa   :  { %2428 = vmatprep.subr.bf16.mxu1 %v2606_v0 }
 0xdab   :  { %2393 = vmatmul.mubr.msk.bf16.vlgmr.msra.gmra.mrb[40].mxu0 %vm82_vm1, %v2111_v2 }
 0xdac   :  { %2405 = vmatpush3.bf16.msra.mxu0 %v2747_v33  ;;  %2408 = vmatprep.mubr.msk.bf16.mxu0 %vm2607_vm0, %v2606_v0 }
 0xdad   :  { %2406 = vmatprep.subr.bf16.mxu0 %v2606_v0 }
 0xdb0   :  { %2407 = vmatpush3.bf16.msra.mxu0 %v2754_v35 }
 0xdb1   :  { %2420 = vmatprep.subr.bf16.mxu0 %v2606_v0 }
 0xe1f   :  { %v1300_v3 = vpop.f32.mrb[36].mxu1 }
 0xe20   :  { %v1313_v5 = vadd.f32 %v1300_v3, %v2783_v49  ;;  %v2386_v31 = vpop.f32.mrb[37].mxu1 }
 0xe21   :  { %v1303_v32 = vpop.f32.mrb[38].mxu1  ;;  %v3120_v31 = vld [vmem:[%s3283_s3] sm:$0xff]  }
 0xe22   :  { %1315 = vrot.lane.b32.xlu0 %v1313_v5, %s2609_s23  ;;  %v2387_v30 = vpop.f32.mrb[39].mxu1 }
 0xe23   :  { %v3142_v30 = vld [vmem:[%s3288_s7] sm:$0xff]  }
 0xe76   :  { %v1253_v34 = vpop.f32.mrb[36].mxu0  ;;  %v1419_v36 = vpop.f32.mrb[40].mxu1 }
 0xe77   :  { %v1254_v33 = vadd.f32 %v2814_v53, %v1253_v34  ;;  %v1432_v38 = vadd.f32 %v1419_v36, %v2715_v8  ;;  %v2378_v39 = vpop.f32.mrb[37].mxu0  ;;  %v2402_v40 = vpop.f32.mrb[41].mxu1  ;;  %v3151_v34 = vld [vmem:[%s3282_s2 + $0x8] sm:$0xff]  }
 0xe78   :  { %v1256_v41 = vpop.f32.mrb[38].mxu0  ;;  %v1422_v35 = vpop.f32.mrb[42].mxu1  ;;  %v3178_v39 = vld [vmem:[%s3289_s6 + $0x8] sm:$0xff]  }
 0xe79   :  { %v1306_v42 = vadd.f32 %v1300_v3, %v1254_v33  ;;  %v2379_v44 = vpop.f32.mrb[39].mxu0  ;;  %1434 = vrot.lane.b32.xlu1 %v1432_v38, %s2609_s23  ;;  %v2403_v45 = vpop.f32.mrb[43].mxu1  ;;  %v3169_v38 = vld [vmem:[%s3289_s6] sm:$0xff]  }
 0xe7b   :  { %v2110_v47 = vmul.f32 -1.442695, %v1306_v42 }
 0xe7d   :  { %2553 = vpow2.f32 %v2110_v47 }
 0xe7e   :  { %v1379_v48 = vpop.f32.mrb[40].mxu0 }
 0xe7f   :  { %v2394_v51 = vpop.f32.mrb[41].mxu0  ;;  %v1380_v61 = vadd.f32 %v3082_v60, %v1379_v48 }
 0xe80   :  { %v1382_v52 = vpop.f32.mrb[42].mxu0 }
 0xe81   :  { %v2395_v54 = vpop.f32.mrb[43].mxu0  ;;  %v1425_v62 = vadd.f32 %v1419_v36, %v1380_v61  ;;  %v2118_v36 = vld [vmem:[%s3285_s1 + $0xc] sm:$0x3] }
 0xe83   :  { %v2114_v6 = vmul.f32 -1.442695, %v1425_v62 }
 0xe87   :  { %v2554_v55 = vpop.eup %2553 }
 0xe88   :  { %v1310_v56 = vadd.f32 1.0, %v2554_v55 }
 0xe8a   :  { %2555 = vrcp.f32 %v1310_v56 }
 0xe8b   :  { %2557 = vpow2.f32 %v2114_v6 }
 0xe94   :  { %v2556_v57 = vpop.eup %2555  ;;  %v1316_v43 = vpop.permute.xlu0 %1315 }
 0xe95   :  { %v1318_v58 = vmul.f32 %v2556_v57, %v1316_v43  ;;  %v2558_v7 = vpop.eup %2557  ;;  %v1325_v20 = vsub.f32 1.0, %v2556_v57  ;;  %v1331_v46 = vmul.f32 %v2556_v57, %v3020_v21 }
 0xe96   :  { %v1429_v9 = vadd.f32 1.0, %v2558_v7 }
 0xe97   :  { %1320 = vrot.lane.b32.xlu0 %v1318_v58, %s2609_s23 }
 0xe98   :  { %2559 = vrcp.f32 %v1429_v9 }
 0xea2   :  { %v2560_v50 = vpop.eup %2559 }
 0xea3   :  { %v1444_v27 = vsub.f32 1.0, %v2560_v50  ;;  %v1450_v59 = vmul.f32 %v2560_v50, %v3032_v12 }
 0xeeb   :  { %v1435_v10 = vpop.permute.xlu1 %1434 }
 0xeec   :  { %v1437_v37 = vmul.f32 %v2560_v50, %v1435_v10 }
 0xeee   :  { %1439 = vrot.lane.b32.xlu1 %v1437_v37, %s2609_s23 }
 0xef2   :  { %1339 = vperm.xlu1 %2489, %v1337_v18  }
 0xf09   :  { %v1321_v13 = vpop.permute.xlu0 %1320 }
 0xf0a   :  { %v1323_v14 = vadd.f32 %v1321_v13, %v1254_v33  ;;  %v3160_v33 = vld [vmem:[%s3288_s7 + $0x8] sm:$0xff]  }
 0xf0c   :  { %2561 = vtanh.f32 %v1323_v14 }
 0xf16   :  { %v2562_v15 = vpop.eup %2561 }
 0xf17   :  { %1327 = vrot.lane.b32.xlu0 %v2562_v15, %s2610_s17 }
 0xf60   :  { %v1440_v17 = vpop.permute.xlu1 %1439 }
 0xf61   :  { %v1442_v19 = vadd.f32 %v1440_v17, %v1380_v61 }
 0xf63   :  { %2563 = vtanh.f32 %v1442_v19 }
 0xf6d   :  { %v2564_v24 = vpop.eup %2563 }
 0xf6e   :  { %1446 = vrot.lane.b32.xlu0 %v2564_v24, %s2610_s17 }
 0xf71   :  { %v3104_v28 = vpop.permute.xlu1 %1339 }
 0xf72   :  { %vm1341_vm13 = vcmp.eq.s32.totalorder %v3104_v28, 1 }
 0xf89   :  { %v1328_v63 = vpop.permute.xlu0 %1327 }
 0xf8a   :  { %v1330_v22 = vmul.f32 %v1328_v63, %v1325_v20 }
 0xf8c   :  { %v1332_v1 = vadd.f32 %v1331_v46, %v1330_v22  ;;  %v1578_v46 = vsel %vm1577_vm14, 1, %v2608_v4 }
 0xf8e   :  { %v3099_v25 = vsel %vm1100_vm11, %v1332_v1, %v3020_v21 }
 0xf8f   :  { %v1500_v26 = vpack.c.bf16 %v3099_v25, %v3099_v25 }
 0xf91   :  { %1502 = vrot.lane.b32.xlu1 %v1500_v26, %s2610_s17 }
 0xfe0   :  { %v1447_v16 = vpop.permute.xlu0 %1446 }
 0xfe1   :  { %v1449_v2 = vmul.f32 %v1447_v16, %v1444_v27 }
 0xfe3   :  { %v1451_v3 = vadd.f32 %v1450_v59, %v1449_v2 }
 0xfe5   :  { %v3111_v21 = vsel %vm1341_vm13, %v1451_v3, %v3032_v12  ;;  %v3129_v12 = vld [vmem:[%s3283_s3 + $0x8] sm:$0xff]  }
 0xfe6   :  { %v1453_v23 = vpack.c.bf16 %v3111_v21, %v3111_v21 }
 0xfe8   :  { %1455 = vrot.lane.b32.xlu0 %v1453_v23, %s2610_s17 }
0x1003   :  { %v1503_v5 = vpop.permute.xlu1 %1502 }
0x1004   :  { %2417 = vmatmul.mubr.msk.bf16.vlgmr.msra.gmra.mrb[44].mxu1 %vm82_vm1, %v1503_v5 }
0x1005   :  { %2429 = vmatpush3.bf16.msra.mxu1 %v3120_v31  ;;  %2432 = vmatprep.mubr.msk.bf16.mxu1 %vm2607_vm0, %v2606_v0 }
0x1006   :  { %2430 = vmatprep.subr.bf16.mxu1 %v2606_v0 }
0x1009   :  { %2431 = vmatpush3.bf16.msra.mxu1 %v3129_v12 }
0x100a   :  { %2444 = vmatprep.subr.bf16.mxu1 %v2606_v0 }
0x105a   :  { %v1456_v32 = vpop.permute.xlu0 %1455 }
0x105b   :  { %2409 = vmatmul.mubr.msk.bf16.vlgmr.msra.gmra.mrb[44].mxu0 %vm82_vm1, %v1456_v32  ;;  %2433 = vmatmul.mubr.msk.bf16.vlgmr.msra.gmra.mrb[48].mxu1 %vm82_vm1, %v1456_v32 }
0x105c   :  { %2421 = vmatpush3.bf16.msra.mxu0 %v3049_v29  ;;  %2424 = vmatprep.mubr.msk.bf16.mxu0 %vm2607_vm0, %v2606_v0 }
0x105d   :  { %2422 = vmatprep.subr.bf16.mxu0 %v2606_v0  ;;  %2445 = vmatpush3.bf16.msra.mxu1 %v3142_v30 }
0x105e   :  { %2446 = vmatprep.subr.bf16.mxu1 %v2606_v0  ;;  %2448 = vmatprep.mubr.msk.bf16.mxu1 %vm2607_vm0, %v2606_v0 }
0x1060   :  { %2423 = vmatpush3.bf16.msra.mxu0 %v3151_v34 }
0x1061   :  { %2447 = vmatpush3.bf16.msra.mxu1 %v3160_v33  ;;  %2436 = vmatprep.subr.bf16.mxu0 %v2606_v0 }
0x1062   :  { %2460 = vmatprep.subr.bf16.mxu1 %v2606_v0 }
0x1063   :  { %2425 = vmatmul.mubr.msk.bf16.vlgmr.msra.gmra.mrb[48].mxu0 %vm82_vm1, %v2118_v36 }
0x1064   :  { %2437 = vmatpush3.bf16.msra.mxu0 %v3169_v38  ;;  %2440 = vmatprep.mubr.msk.bf16.mxu0 %vm2607_vm0, %v2606_v0 }
0x1065   :  { %2438 = vmatprep.subr.bf16.mxu0 %v2606_v0 }
0x1068   :  { %2439 = vmatpush3.bf16.msra.mxu0 %v3178_v39 }
0x1069   :  { %2452 = vmatprep.subr.bf16.mxu0 %v2606_v0 }
0x10d7   :  { %v1541_v40 = vpop.f32.mrb[44].mxu1 }
0x10d8   :  { %v1554_v41 = vadd.f32 %v1541_v40, %v2783_v49  ;;  %v2418_v35 = vpop.f32.mrb[45].mxu1 }
0x10d9   :  { %v1544_v42 = vpop.f32.mrb[46].mxu1 }
0x10da   :  { %1556 = vrot.lane.b32.xlu1 %v1554_v41, %s2609_s23  ;;  %v2419_v44 = vpop.f32.mrb[47].mxu1 }
0x112e   :  { %v1494_v45 = vpop.f32.mrb[44].mxu0  ;;  %v1660_v47 = vpop.f32.mrb[48].mxu1 }
0x112f   :  { %v1495_v48 = vadd.f32 %v2814_v53, %v1494_v45  ;;  %v1673_v51 = vadd.f32 %v1660_v47, %v2715_v8  ;;  %v2410_v52 = vpop.f32.mrb[45].mxu0  ;;  %v2434_v54 = vpop.f32.mrb[49].mxu1 }
0x1130   :  { %v1497_v55 = vpop.f32.mrb[46].mxu0  ;;  %v1663_v56 = vpop.f32.mrb[50].mxu1 }
0x1131   :  { %v1547_v57 = vadd.f32 %v1541_v40, %v1495_v48  ;;  %v2411_v43 = vpop.f32.mrb[47].mxu0  ;;  %1675 = vrot.lane.b32.xlu0 %v1673_v51, %s2609_s23  ;;  %v2435_v58 = vpop.f32.mrb[51].mxu1 }
0x1133   :  { %v2117_v61 = vmul.f32 -1.442695, %v1547_v57 }
0x1135   :  { %2565 = vpow2.f32 %v2117_v61 }
0x1136   :  { %v1620_v62 = vpop.f32.mrb[48].mxu0 }
0x1137   :  { %v2426_v6 = vpop.f32.mrb[49].mxu0  ;;  %v1621_v13 = vadd.f32 %v3082_v60, %v1620_v62 }
0x1138   :  { %v1623_v7 = vpop.f32.mrb[50].mxu0 }
0x1139   :  { %v2427_v9 = vpop.f32.mrb[51].mxu0  ;;  %v1666_v14 = vadd.f32 %v1660_v47, %v1621_v13 }
0x113b   :  { %v2121_v15 = vmul.f32 -1.442695, %v1666_v14 }
0x113f   :  { %v2566_v50 = vpop.eup %2565 }
0x1140   :  { %v1551_v10 = vadd.f32 1.0, %v2566_v50 }
0x1142   :  { %2567 = vrcp.f32 %v1551_v10 }
0x1143   :  { %2569 = vpow2.f32 %v2121_v15 }
0x114c   :  { %v2568_v53 = vpop.eup %2567  ;;  %v1557_v37 = vpop.permute.xlu1 %1556 }
0x114d   :  { %v1559_v18 = vmul.f32 %v2568_v53, %v1557_v37  ;;  %v2570_v17 = vpop.eup %2569  ;;  %v1566_v2 = vsub.f32 1.0, %v2568_v53  ;;  %v1572_v23 = vmul.f32 %v2568_v53, %v3099_v25 }
0x114e   :  { %v1670_v19 = vadd.f32 1.0, %v2570_v17 }
0x114f   :  { %1561 = vrot.lane.b32.xlu1 %v1559_v18, %s2609_s23 }
0x1150   :  { %2571 = vrcp.f32 %v1670_v19 }
0x115a   :  { %v2572_v24 = vpop.eup %2571 }
0x115b   :  { %v1685_v41 = vsub.f32 1.0, %v2572_v24  ;;  %v1691_v44 = vmul.f32 %v2572_v24, %v3111_v21 }
0x11a3   :  { %v1676_v20 = vpop.permute.xlu0 %1675 }
0x11a4   :  { %v1678_v63 = vmul.f32 %v2572_v24, %v1676_v20 }
0x11a6   :  { %1680 = vrot.lane.b32.xlu0 %v1678_v63, %s2609_s23 }
0x11aa   :  { %1580 = vperm.xlu0 %2490, %v1578_v46  }
0x11c1   :  { %v1562_v22 = vpop.permute.xlu1 %1561 }
0x11c2   :  { %v1564_v1 = vadd.f32 %v1562_v22, %v1495_v48 }
0x11c4   :  { %2573 = vtanh.f32 %v1564_v1 }
0x11ce   :  { %v2574_v26 = vpop.eup %2573 }
0x11cf   :  { %1568 = vrot.lane.b32.xlu1 %v2574_v26, %s2610_s17 }
0x1218   :  { %v1681_v27 = vpop.permute.xlu0 %1680 }
0x1219   :  { %v1683_v16 = vadd.f32 %v1681_v27, %v1621_v13 }
0x121b   :  { %2575 = vtanh.f32 %v1683_v16 }
0x1225   :  { %v2576_v59 = vpop.eup %2575 }
0x1226   :  { %1687 = vrot.lane.b32.xlu1 %v2576_v59, %s2610_s17 }
0x1229   :  { %v3203_v42 = vpop.permute.xlu0 %1580 }
0x122a   :  { %vm1582_vm15 = vcmp.eq.s32.totalorder %v3203_v42, 1 }
0x1241   :  { %v1569_v3 = vpop.permute.xlu1 %1568 }
0x1242   :  { %v1571_v5 = vmul.f32 %v1569_v3, %v1566_v2 }
0x1244   :  { %v1573_v32 = vadd.f32 %v1572_v23, %v1571_v5 }
0x1246   :  { %v3198_v36 = vsel %vm1341_vm13, %v1573_v32, %v3099_v25 }
0x1247   :  { %v1741_v40 = vpack.c.bf16 %v3198_v36, %v3198_v36 }
0x1249   :  { %1743 = vrot.lane.b32.xlu0 %v1741_v40, %s2610_s17 }
0x1298   :  { %v1688_v35 = vpop.permute.xlu1 %1687 }
0x1299   :  { %v1690_v45 = vmul.f32 %v1688_v35, %v1685_v41 }
0x129b   :  { %v1692_v47 = vadd.f32 %v1691_v44, %v1690_v45 }
0x129d   :  { %v3210_v25 = vsel %vm1582_vm15, %v1692_v47, %v3111_v21 }
0x129e   :  { %v1694_v28 = vpack.c.bf16 %v3210_v25, %v3210_v25 }
0x12a0   :  { %1696 = vrot.lane.b32.xlu1 %v1694_v28, %s2610_s17 }
0x12bb   :  { %v1744_v48 = vpop.permute.xlu0 %1743 }
0x12bc   :  { %2449 = vmatmul.mubr.msk.bf16.vlgmr.msra.gmra.mrb[52].mxu1 %vm82_vm1, %v1744_v48 }
0x12bd   :  { %2461 = vmatpush3.bf16.msra.mxu1 %v3120_v31  ;;  %2464 = vmatprep.mubr.msk.bf16.mxu1 %vm2607_vm0, %v2606_v0  ;;  %v2125_v31 = vld [vmem:[%s3285_s1 + $0xe] sm:$0x3] }
0x12be   :  { %2462 = vmatprep.subr.bf16.mxu1 %v2606_v0 }
0x12c1   :  { %2463 = vmatpush3.bf16.msra.mxu1 %v3129_v12 }
0x12c2   :  { %2476 = vmatprep.subr.bf16.mxu1 %v2606_v0 }
0x1312   :  { %v1697_v21 = vpop.permute.xlu1 %1696 }
0x1313   :  { %2441 = vmatmul.mubr.msk.bf16.vlgmr.msra.gmra.mrb[52].mxu0 %vm82_vm1, %v1697_v21  ;;  %2465 = vmatmul.mubr.msk.bf16.vlgmr.msra.gmra.mrb[56].mxu1 %vm82_vm1, %v1697_v21 }
0x1314   :  { %2453 = vmatpush3.bf16.msra.mxu0 %v3049_v29  ;;  %2456 = vmatprep.mubr.msk.bf16.mxu0 %vm2607_vm0, %v2606_v0 }
0x1315   :  { %2454 = vmatprep.subr.bf16.mxu0 %v2606_v0  ;;  %2477 = vmatpush3.bf16.msra.mxu1 %v3142_v30 }
0x1316   :  { %2478 = vmatprep.subr.bf16.mxu1 %v2606_v0  ;;  %2480 = vmatprep.mubr.msk.bf16.mxu1 %vm2607_vm0, %v2606_v0 }
0x1318   :  { %2455 = vmatpush3.bf16.msra.mxu0 %v3151_v34 }
0x1319   :  { %2479 = vmatpush3.bf16.msra.mxu1 %v3160_v33  ;;  %2468 = vmatprep.subr.bf16.mxu0 %v2606_v0 }
0x131b   :  { %2457 = vmatmul.mubr.msk.bf16.vlgmr.msra.gmra.mrb[56].mxu0 %vm82_vm1, %v2125_v31 }
0x131c   :  { %2469 = vmatpush3.bf16.msra.mxu0 %v3169_v38  ;;  %2472 = vmatprep.mubr.msk.bf16.mxu0 %vm2607_vm0, %v2606_v0  ;;  %v3249_v38 = vld [vmem:[%s3291_s8] ss:$0 sm:$0xff]  ;;  %vm1818_vm0 = vcmp.gt.s32.totalorder %v3088_v11, 7 }
0x131d   :  { %2470 = vmatprep.subr.bf16.mxu0 %v2606_v0  ;;  %v1819_v46 = vsel %vm1818_vm0, 1, %v2608_v4 }
0x1320   :  { %2471 = vmatpush3.bf16.msra.mxu0 %v3178_v39 }
0x138f   :  { %v1782_v29 = vpop.f32.mrb[52].mxu1 }
0x1390   :  { %v1795_v12 = vadd.f32 %v1782_v29, %v2783_v49  ;;  %v2450_v30 = vpop.f32.mrb[53].mxu1 }
0x1391   :  { %v1785_v34 = vpop.f32.mrb[54].mxu1 }
0x1392   :  { %1797 = vrot.lane.b32.xlu0 %v1795_v12, %s2609_s23  ;;  %v2451_v33 = vpop.f32.mrb[55].mxu1 }
0x13e6   :  { %v1735_v51 = vpop.f32.mrb[52].mxu0  ;;  %v1901_v52 = vpop.f32.mrb[56].mxu1 }
0x13e7   :  { %v1736_v54 = vadd.f32 %v3249_v38, %v1735_v51  ;;  %v1914_v0 = vadd.f32 %v1901_v52, %v2715_v8  ;;  %v2442_v39 = vpop.f32.mrb[53].mxu0  ;;  %v2466_v55 = vpop.f32.mrb[57].mxu1 }
0x13e8   :  { %v1738_v56 = vpop.f32.mrb[54].mxu0  ;;  %v1904_v57 = vpop.f32.mrb[58].mxu1 }
0x13e9   :  { %v1788_v43 = vadd.f32 %v1782_v29, %v1736_v54  ;;  %v2443_v58 = vpop.f32.mrb[55].mxu0  ;;  %1916 = vrot.lane.b32.xlu1 %v1914_v0, %s2609_s23  ;;  %v2467_v61 = vpop.f32.mrb[59].mxu1 }
0x13eb   :  { %v2124_v62 = vmul.f32 -1.442695, %v1788_v43 }
0x13ed   :  { %2577 = vpow2.f32 %v2124_v62 }
0x13ee   :  { %v1861_v6 = vpop.f32.mrb[56].mxu0 }
0x13ef   :  { %v2458_v7 = vpop.f32.mrb[57].mxu0  ;;  %v1862_v13 = vadd.f32 %v3082_v60, %v1861_v6 }
0x13f0   :  { %v1864_v9 = vpop.f32.mrb[58].mxu0 }
0x13f1   :  { %v2459_v50 = vpop.f32.mrb[59].mxu0  ;;  %v1907_v14 = vadd.f32 %v1901_v52, %v1862_v13 }
0x13f3   :  { %v2128_v15 = vmul.f32 -1.442695, %v1907_v14 }
0x13f7   :  { %v2578_v10 = vpop.eup %2577 }
0x13f8   :  { %v1792_v53 = vadd.f32 1.0, %v2578_v10 }
0x13fa   :  { %2579 = vrcp.f32 %v1792_v53 }
0x13fb   :  { %2581 = vpow2.f32 %v2128_v15 }
0x1404   :  { %v2580_v37 = vpop.eup %2579  ;;  %v1798_v8 = vpop.permute.xlu0 %1797 }
0x1405   :  { %v1800_v18 = vmul.f32 %v2580_v37, %v1798_v8  ;;  %v2582_v17 = vpop.eup %2581  ;;  %v1807_v59 = vsub.f32 1.0, %v2580_v37  ;;  %v1813_v11 = vmul.f32 %v2580_v37, %v3198_v36 }
0x1406   :  { %v1911_v19 = vadd.f32 1.0, %v2582_v17 }
0x1407   :  { %1802 = vrot.lane.b32.xlu0 %v1800_v18, %s2609_s23 }
0x1408   :  { %2583 = vrcp.f32 %v1911_v19 }
0x1412   :  { %v2584_v24 = vpop.eup %2583 }
0x1413   :  { %v1926_v32 = vsub.f32 1.0, %v2584_v24  ;;  %v1932_v35 = vmul.f32 %v2584_v24, %v3210_v25 }
0x145b   :  { %v1917_v20 = vpop.permute.xlu1 %1916 }
0x145c   :  { %v1919_v63 = vmul.f32 %v2584_v24, %v1917_v20 }
0x145e   :  { %1921 = vrot.lane.b32.xlu1 %v1919_v63, %s2609_s23 }
0x1462   :  { %1821 = vperm.xlu1 %2489, %v1819_v46  }
0x1479   :  { %v1803_v22 = vpop.permute.xlu0 %1802 }
0x147a   :  { %v1805_v1 = vadd.f32 %v1803_v22, %v1736_v54 }
0x147c   :  { %2585 = vtanh.f32 %v1805_v1 }
0x1486   :  { %v2586_v60 = vpop.eup %2585 }
0x1487   :  { %1809 = vrot.lane.b32.xlu0 %v2586_v60, %s2610_s17 }
0x14d0   :  { %v1922_v26 = vpop.permute.xlu1 %1921 }
0x14d1   :  { %v1924_v27 = vadd.f32 %v1922_v26, %v1862_v13 }
0x14d3   :  { %2587 = vtanh.f32 %v1924_v27 }
0x14dd   :  { %v2588_v16 = vpop.eup %2587 }
0x14de   :  { %1928 = vrot.lane.b32.xlu0 %v2588_v16, %s2610_s17 }
0x14e1   :  { %v1822_v41 = vpop.permute.xlu1 %1821 }
0x14e2   :  { %vm1823_vm2 = vcmp.eq.s32.totalorder %v1822_v41, 1 }
0x14f9   :  { %v1810_v2 = vpop.permute.xlu0 %1809 }
0x14fa   :  { %v1812_v3 = vmul.f32 %v1810_v2, %v1807_v59 }
0x14fc   :  { %v1814_v23 = vadd.f32 %v1813_v11, %v1812_v3 }
0x14fe   :  { %v1815_v4 = vsel %vm1582_vm15, %v1814_v23, %v3198_v36 }
0x14ff   :  { %v1982_v5 = vpack.c.bf16 %v1815_v4, %v1815_v4 }
0x1501   :  { %1984 = vrot.lane.b32.xlu1 %v1982_v5, %s2610_s17 }
0x1550   :  { %v1929_v40 = vpop.permute.xlu0 %1928 }
0x1551   :  { %v1931_v44 = vmul.f32 %v1929_v40, %v1926_v32 }
0x1553   :  { %v1933_v45 = vadd.f32 %v1932_v35, %v1931_v44 }
0x1555   :  { %v1934_v47 = vsel %vm1823_vm2, %v1933_v45, %v3210_v25 }
0x1556   :  { %v1935_v28 = vpack.c.bf16 %v1934_v47, %v1934_v47 }
0x1558   :  { %1937 = vrot.lane.b32.xlu0 %v1935_v28, %s2610_s17 }
0x1573   :  { %v1985_v48 = vpop.permute.xlu1 %1984 }
0x1574   :  { %2481 = vmatmul.mubr.msk.bf16.vlgmr.msra.gmra.mrb[60].mxu1 %vm82_vm1, %v1985_v48 }
0x15ca   :  { %v1938_v36 = vpop.permute.xlu0 %1937 }
0x15cb   :  { %2473 = vmatmul.mubr.msk.bf16.vlgmr.msra.gmra.mrb[60].mxu0 %vm82_vm1, %v1938_v36  ;;  %vm2061_vm1 = vcmask 257024  }
0x1647   :  { %v2023_v42 = vpop.f32.mrb[60].mxu1 }
0x1648   :  { %v2036_v21 = vadd.f32 %v2023_v42, %v2783_v49  ;;  %v2482_v31 = vpop.f32.mrb[61].mxu1 }
0x1649   :  { %v2026_v29 = vpop.f32.mrb[62].mxu1 }
0x164a   :  { %2038 = vrot.lane.b32.xlu1 %v2036_v21, %s2609_s23  ;;  %v2483_v12 = vpop.f32.mrb[63].mxu1 }
0x169e   :  { %v1976_v30 = vpop.f32.mrb[60].mxu0 }
0x169f   :  { %v1977_v25 = vadd.f32 %v3249_v38, %v1976_v30  ;;  %v2474_v34 = vpop.f32.mrb[61].mxu0 }
0x16a0   :  { %v1979_v33 = vpop.f32.mrb[62].mxu0 }
0x16a1   :  { %v2029_v51 = vadd.f32 %v2023_v42, %v1977_v25  ;;  %v2475_v52 = vpop.f32.mrb[63].mxu0 }
0x16a3   :  { %v2131_v54 = vmul.f32 -1.442695, %v2029_v51 }
0x16a5   :  { %2589 = vpow2.f32 %v2131_v54 }
0x16af   :  { %v2590_v0 = vpop.eup %2589 }
0x16b0   :  { %v2033_v39 = vadd.f32 1.0, %v2590_v0 }
0x16b2   :  { %2591 = vrcp.f32 %v2033_v39 }
0x16bc   :  { %v2592_v55 = vpop.eup %2591  ;;  %v2039_v56 = vpop.permute.xlu1 %2038 }
0x16bd   :  { %v2041_v49 = vmul.f32 %v2592_v55, %v2039_v56  ;;  %v2048_v38 = vsub.f32 1.0, %v2592_v55  ;;  %v2054_v62 = vmul.f32 %v2592_v55, %v1815_v4 }
0x16bf   :  { %2043 = vrot.lane.b32.xlu0 %v2041_v49, %s2609_s23 }
0x1731   :  { %v2044_v57 = vpop.permute.xlu0 %2043 }
0x1732   :  { %v2046_v43 = vadd.f32 %v2044_v57, %v1977_v25 }
0x1734   :  { %2593 = vtanh.f32 %v2046_v43 }
0x173e   :  { %v2594_v58 = vpop.eup %2593 }
0x173f   :  { %2050 = vrot.lane.b32.xlu1 %v2594_v58, %s2610_s17 }
0x17b1   :  { %v2051_v61 = vpop.permute.xlu1 %2050 }
0x17b2   :  { %v2053_v6 = vmul.f32 %v2051_v61, %v2048_v38 }
0x17b4   :  { %v2055_v7 = vadd.f32 %v2054_v62, %v2053_v6 }
0x17b6   :  { %v2056_v9 = vsel %vm1823_vm2, %v2055_v7, %v1815_v4 }
0x17b7   :  { %2058 = vrot.lane.b32.xlu0 %v2056_v9, %s2610_s17 }
0x1829   :  { %v2059_v50 = vpop.permute.xlu0 %2058 }
0x182a   :  { %2062 = vst.msk [vmem:[%s3292_s10] sm:$0xf] %vm2061_vm1, %v2059_v50 }

</bundles_post_ra>
